<compile_context>
chip_gen: v6e
topology: v6e:2x2x1
jax: 0.10.0
libtpu: 0.0.40
codegen_flags: <defaults>
</compile_context>

<pallas_src>
import functools

import jax
import jax.numpy as jnp
from jax.experimental import pallas as pl
from jax.experimental.pallas import tpu as pltpu

EPS = 1e-6          # RMSNorm epsilon
NEG_INF = -1e30     # finite "masked" bias: exp() underflows to exactly 0 in f32


def _fused_perceiver_kernel(n_heads, head_dim,
                            x_ref, mask_ref, lat0_ref,
                            wq_ref, bq_ref, wkv_ref, bkv_ref,
                            wo_ref, bo_ref, pn_w_ref,
                            w1_ref, b1_ref, w2_ref, b2_ref, final_w_ref,
                            out_ref,
                            lat_scr, kx_scr, vx_scr):
    """One (batch, layer) grid step of the fused PerceiverPooling forward.

    x_ref:    (P, D)      bf16  input sequence (per batch element)
    mask_ref: (1, P)      f32   1.0 = attend, 0.0 = masked
    lat0_ref: (K, D)      f32   learned latent queries (shared across batch)
    out_ref:  (K, D)      f32   pooled output (written on the last layer only)
    lat_scr:  (K, D)      f32   latent residual stream, persists across layers
    kx_scr:   (H, P, dh)  bf16  cached K(x) (computed once per batch element)
    vx_scr:   (H, P, dh)  bf16  cached V(x)
    """
    layer = pl.program_id(1)
    H, dh = n_heads, head_dim
    D = H * dh

    @pl.when(layer == 0)
    def _init():
        # Latent residual stream starts from the learned latents.
        lat_scr[...] = lat0_ref[...].astype(jnp.float32)
        # K/V over x depend only on x and the layer-shared weights -> compute
        # once per batch element (single MXU-friendly (P,D)x(D,2D) matmul) and
        # cache head-major in VMEM for every subsequent layer.
        kvx = (jnp.dot(x_ref[...], wkv_ref[...],
                       preferred_element_type=jnp.float32)
               + bkv_ref[...]).astype(jnp.bfloat16)            # (P, 2D)
        for h in range(H):
            kx_scr[h] = kvx[:, h * dh:(h + 1) * dh]
            vx_scr[h] = kvx[:, D + h * dh:D + (h + 1) * dh]

    lat = lat_scr[...]                                         # (K, D) f32
    lat_bf = lat.astype(jnp.bfloat16)

    # ----- projections: full-width bf16 matmuls with f32 accumulation -------
    # 1/head_dim score scale folded into q right after the projection.
    q = (jnp.dot(lat_bf, wq_ref[...], preferred_element_type=jnp.float32)
         + bq_ref[...]) * (1.0 / float(dh))                    # (K, D)
    kvl = (jnp.dot(lat_bf, wkv_ref[...], preferred_element_type=jnp.float32)
           + bkv_ref[...])                                     # (K, 2D) fused K|V

    def split_heads(m):  # (R, H*dh) -> (H, R, dh); '(h d)' head-major columns
        return jnp.stack([m[:, h * dh:(h + 1) * dh] for h in range(H)], axis=0)

    q3 = split_heads(q).astype(jnp.bfloat16)                   # (H, K, dh)
    kl3 = split_heads(kvl[:, :D]).astype(jnp.bfloat16)         # (H, K, dh)
    vl3 = split_heads(kvl[:, D:]).astype(jnp.bfloat16)         # (H, K, dh)
    kx3 = kx_scr[...]                                          # (H, P, dh)
    vx3 = vx_scr[...]                                          # (H, P, dh)

    # ----- attention over [x ; latents] without materializing the concat ----
    bias_x = jnp.where(mask_ref[...] > 0.5, 0.0, NEG_INF)      # (1, P)
    s_x = jnp.einsum('hke,hpe->hkp', q3, kx3,
                     preferred_element_type=jnp.float32) + bias_x   # (H, K, P)
    s_l = jnp.einsum('hke,hje->hkj', q3, kl3,
                     preferred_element_type=jnp.float32)            # (H, K, K)

    m_max = jnp.maximum(jnp.max(s_x, axis=-1, keepdims=True),
                        jnp.max(s_l, axis=-1, keepdims=True))        # (H, K, 1)
    p_x = jnp.exp(s_x - m_max)
    p_l = jnp.exp(s_l - m_max)
    denom = (jnp.sum(p_x, axis=-1, keepdims=True)
             + jnp.sum(p_l, axis=-1, keepdims=True))
    inv = pl.reciprocal(denom, approx=True)                    # EUP slot, ~free

    attn3 = (jnp.einsum('hkp,hpe->hke', p_x.astype(jnp.bfloat16), vx3,
                        preferred_element_type=jnp.float32)
             + jnp.einsum('hkj,hje->hke', p_l.astype(jnp.bfloat16), vl3,
                          preferred_element_type=jnp.float32)) * inv  # (H,K,dh)

    # merge heads back into the (K, D) '(h d)' lane layout, then out-proj
    attn = jnp.concatenate([attn3[h] for h in range(H)], axis=-1)     # (K, D)
    attn_out = (jnp.dot(attn.astype(jnp.bfloat16), wo_ref[...],
                        preferred_element_type=jnp.float32) + bo_ref[...])
    attn_out = attn_out + lat                                  # += residual

    # postnorm RMSNorm (f32)
    ms = jnp.mean(attn_out * attn_out, axis=-1, keepdims=True)
    normed = attn_out * jax.lax.rsqrt(ms + EPS) * pn_w_ref[...]

    # MLP
    # TODO(synk): MLP class body is not in the source; assuming the standard
    # Linear(D, 4D) -> GELU(tanh approx) -> Linear(4D, D).
    hdn = (jnp.dot(normed.astype(jnp.bfloat16), w1_ref[...],
                   preferred_element_type=jnp.float32) + b1_ref[...])
    hdn = jax.nn.gelu(hdn, approximate=True)
    mlp_out = (jnp.dot(hdn.astype(jnp.bfloat16), w2_ref[...],
                       preferred_element_type=jnp.float32) + b2_ref[...])

    # Second residual adds the ORIGINAL layer-input latents (per the spec).
    new_lat = mlp_out + lat
    lat_scr[...] = new_lat

    @pl.when(layer == pl.num_programs(1) - 1)
    def _finalize():
        # Final PerceiverPooling RMSNorm fused into the epilogue.
        msf = jnp.mean(new_lat * new_lat, axis=-1, keepdims=True)
        out_ref[...] = (new_lat * jax.lax.rsqrt(msf + EPS)
                        * final_w_ref[...]).astype(out_ref.dtype)


def perceiver_pooling(x, attention_mask, params, n_layers, n_heads):
    """Fused PerceiverPooling forward: all layers + final RMSNorm in ONE kernel."""
    B, P, D = x.shape
    K = params["latents"].shape[0]
    head_dim = D // n_heads
    blk = params["block"]
    Dm = blk["w1"].shape[1]

    bf = lambda a: a.astype(jnp.bfloat16)
    # Fused [K | V] projection weight: columns ordered [k:(h d) | v:(h d)].
    wkv = jnp.concatenate([blk["wk"], blk["wv"]], axis=1)      # (D, 2D)
    bkv = jnp.concatenate([blk["bk"], blk["bv"]], axis=1)      # (1, 2D)

    x_bf = bf(x)
    mask3 = attention_mask.reshape(B, 1, P).astype(jnp.float32)

    const2d = lambda r, c: pl.BlockSpec((r, c), lambda b, l: (0, 0))
    kernel = functools.partial(_fused_perceiver_kernel, n_heads, head_dim)

    # Weight/bias index maps are constant -> the pipeline fetches them once.
    # (pl.Buffered(1) on these specs would additionally halve their VMEM
    #  double-buffers at large D; omitted here for portability.)
    return pl.pallas_call(
        kernel,
        out_shape=jax.ShapeDtypeStruct((B, K, D), jnp.float32),
        grid=(B, n_layers),
        in_specs=[
            pl.BlockSpec((None, P, D), lambda b, l: (b, 0, 0)),    # x
            pl.BlockSpec((None, 1, P), lambda b, l: (b, 0, 0)),    # mask
            const2d(K, D),                                         # latents
            const2d(D, D), const2d(1, D),                          # wq, bq
            const2d(D, 2 * D), const2d(1, 2 * D),                  # wkv, bkv
            const2d(D, D), const2d(1, D),                          # wo, bo
            const2d(1, D),                                         # postnorm w
            const2d(D, Dm), const2d(1, Dm),                        # mlp fc1
            const2d(Dm, D), const2d(1, D),                         # mlp fc2
            const2d(1, D),                                         # final norm w
        ],
        out_specs=pl.BlockSpec((None, K, D), lambda b, l: (b, 0, 0)),
        scratch_shapes=[
            pltpu.VMEM((K, D), jnp.float32),                       # latent stream
            pltpu.VMEM((n_heads, P, head_dim), jnp.bfloat16),      # cached K(x)
            pltpu.VMEM((n_heads, P, head_dim), jnp.bfloat16),      # cached V(x)
        ],
        compiler_params=pltpu.CompilerParams(
            dimension_semantics=("parallel", "arbitrary"),
            vmem_limit_bytes=48 * 1024 * 1024),
    )(x_bf, mask3, params["latents"],
      bf(blk["wq"]), blk["bq"], bf(wkv), bkv,
      bf(blk["wo"]), blk["bo"], blk["pn_w"],
      bf(blk["w1"]), blk["b1"], bf(blk["w2"]), blk["b2"],
      params["final_pn_w"].reshape(1, D))


def _reference(x, attention_mask, params, n_layers, n_heads):
    """Pure-JAX f32 reference mirroring the PyTorch forward."""
    blk = params["block"]
    B, P, D = x.shape
    H = n_heads
    dh = D // H
    lat = jnp.broadcast_to(params["latents"][None],
                           (B,) + params["latents"].shape)
    for _ in range(n_layers):
        residual = lat
        h = jnp.concatenate([x, lat], axis=1)                          # (B, N, D)
        q = lat @ blk["wq"] + blk["bq"]
        k = h @ blk["wk"] + blk["bk"]
        v = h @ blk["wv"] + blk["bv"]
        qh = q.reshape(B, -1, H, dh)
        kh = k.reshape(B, -1, H, dh)
        vh = v.reshape(B, -1, H, dh)
        s = jnp.einsum('bkhd,bnhd->bhkn', qh, kh) / float(dh)
        am = jnp.concatenate(
            [attention_mask, jnp.ones((B, lat.shape[1]), x.dtype)], axis=-1)
        s = s + jnp.where(am[:, None, None, :] > 0.5, 0.0, -jnp.inf)
        p = jax.nn.softmax(s, axis=-1)
        ao = jnp.einsum('bhkn,bnhd->bkhd', p, vh).reshape(B, -1, D)
        ao = ao @ blk["wo"] + blk["bo"]
        ao = ao + residual
        ms = jnp.mean(ao * ao, axis=-1, keepdims=True)
        nrm = ao * jax.lax.rsqrt(ms + EPS) * blk["pn_w"]
        hid = jax.nn.gelu(nrm @ blk["w1"] + blk["b1"], approximate=True)
        mlp = hid @ blk["w2"] + blk["b2"]
        lat = mlp + residual
    ms = jnp.mean(lat * lat, axis=-1, keepdims=True)
    return lat * jax.lax.rsqrt(ms + EPS) * params["final_pn_w"]


def init_params(key, out_seq_len, n_heads, hidden_size, mlp_dim):
    D = hidden_size
    ks = jax.random.split(key, 8)

    def lin(k, fan_in, fan_out, scale=0.02):
        return jax.random.normal(k, (fan_in, fan_out), jnp.float32) * scale

    # Packed kv projection, unpacked exactly like rearrange 'b n (h d kv)'.
    wkv = lin(ks[2], D, 2 * D)
    bkv = jax.random.normal(ks[3], (2 * D,), jnp.float32) * 0.01
    dh = D // n_heads
    wkv_r = wkv.reshape(D, n_heads, dh, 2)
    bkv_r = bkv.reshape(n_heads, dh, 2)

    block = dict(
        wq=lin(ks[0], D, D),
        bq=(jax.random.normal(ks[1], (D,), jnp.float32) * 0.01).reshape(1, D),
        wk=wkv_r[..., 0].reshape(D, D),
        bk=bkv_r[..., 0].reshape(1, D),
        wv=wkv_r[..., 1].reshape(D, D),
        bv=bkv_r[..., 1].reshape(1, D),
        wo=lin(ks[4], D, D),
        bo=(jax.random.normal(ks[5], (D,), jnp.float32) * 0.01).reshape(1, D),
        pn_w=jnp.ones((1, D), jnp.float32),          # RMSNorm default init
        w1=lin(ks[6], D, mlp_dim),
        b1=jnp.zeros((1, mlp_dim), jnp.float32),
        w2=lin(ks[7], mlp_dim, D),
        b2=jnp.zeros((1, D), jnp.float32),
    )
    latents = jax.random.normal(jax.random.fold_in(key, 123),
                                (out_seq_len, D), jnp.float32)
    return dict(block=block,
                latents=latents,
                final_pn_w=jnp.ones((D,), jnp.float32))


if __name__ == "__main__":
    B, P, D = 2, 16, 32          # batch, in_seq_len, hidden_size
    K = 8                        # out_seq_len
    n_heads = 4
    n_layers = 2
    mlp_dim = 4 * D

    key = jax.random.PRNGKey(0)
    k_x, k_p = jax.random.split(key)

    x = jax.random.normal(k_x, (B, P, D), jnp.float32)
    # mask out the last 4 input positions of batch element 1
    attention_mask = jnp.ones((B, P), jnp.float32).at[1, -4:].set(0.0)

    params = init_params(k_p, K, n_heads, D, mlp_dim)

    out = perceiver_pooling(x, attention_mask, params, n_layers, n_heads)
    out = jax.block_until_ready(out)
    assert out.shape == (B, K, D)
    assert bool(jnp.all(jnp.isfinite(out)))

    ref = _reference(x, attention_mask, params, n_layers, n_heads)
    err = float(jnp.max(jnp.abs(out - ref)))
    # bf16 matmuls + approx reciprocal vs. the pure-f32 reference
    assert err < 7.5e-2, f"max |kernel - reference| = {err}"

    print("KERNEL_OK")
</pallas_src>

<mosaic_0001>
module attributes {stable_mosaic.version = 11 : i64} {
  func.func @_fused_perceiver_kernel(%arg0: i32, %arg1: i32, %arg2: memref<1x16x32xbf16, #tpu.memory_space<vmem>>, %arg3: memref<1x1x16xf32, #tpu.memory_space<vmem>>, %arg4: memref<8x32xf32, #tpu.memory_space<vmem>>, %arg5: memref<32x32xbf16, #tpu.memory_space<vmem>>, %arg6: memref<1x32xf32, #tpu.memory_space<vmem>>, %arg7: memref<32x64xbf16, #tpu.memory_space<vmem>>, %arg8: memref<1x64xf32, #tpu.memory_space<vmem>>, %arg9: memref<32x32xbf16, #tpu.memory_space<vmem>>, %arg10: memref<1x32xf32, #tpu.memory_space<vmem>>, %arg11: memref<1x32xf32, #tpu.memory_space<vmem>>, %arg12: memref<32x128xbf16, #tpu.memory_space<vmem>>, %arg13: memref<1x128xf32, #tpu.memory_space<vmem>>, %arg14: memref<128x32xbf16, #tpu.memory_space<vmem>>, %arg15: memref<1x32xf32, #tpu.memory_space<vmem>>, %arg16: memref<1x32xf32, #tpu.memory_space<vmem>>, %arg17: memref<1x8x32xf32, #tpu.memory_space<vmem>>, %arg18: memref<8x32xf32, #tpu.memory_space<vmem>>, %arg19: memref<4x16x8xbf16, #tpu.memory_space<vmem>>, %arg20: memref<4x16x8xbf16, #tpu.memory_space<vmem>>) attributes {dimension_semantics = [#tpu.dimension_semantics<parallel>, #tpu.dimension_semantics<arbitrary>], iteration_bounds = array<i64: 2, 2>, scalar_prefetch = 0 : i64, scratch_operands = 3 : i64, tpu.core_type = #tpu.core_type<tc>, window_params = [{transform_indices = @transform_0, window_bounds = array<i64: 1, 16, 32>}, {transform_indices = @transform_1, window_bounds = array<i64: 1, 1, 16>}, {pipeline_mode = #tpu.pipeline_mode<synchronous>, transform_indices = @transform_2, window_bounds = array<i64: 8, 32>}, {pipeline_mode = #tpu.pipeline_mode<synchronous>, transform_indices = @transform_3, window_bounds = array<i64: 32, 32>}, {pipeline_mode = #tpu.pipeline_mode<synchronous>, transform_indices = @transform_4, window_bounds = array<i64: 1, 32>}, {pipeline_mode = #tpu.pipeline_mode<synchronous>, transform_indices = @transform_5, window_bounds = array<i64: 32, 64>}, {pipeline_mode = #tpu.pipeline_mode<synchronous>, transform_indices = @transform_6, window_bounds = array<i64: 1, 64>}, {pipeline_mode = #tpu.pipeline_mode<synchronous>, transform_indices = @transform_7, window_bounds = array<i64: 32, 32>}, {pipeline_mode = #tpu.pipeline_mode<synchronous>, transform_indices = @transform_8, window_bounds = array<i64: 1, 32>}, {pipeline_mode = #tpu.pipeline_mode<synchronous>, transform_indices = @transform_9, window_bounds = array<i64: 1, 32>}, {pipeline_mode = #tpu.pipeline_mode<synchronous>, transform_indices = @transform_10, window_bounds = array<i64: 32, 128>}, {pipeline_mode = #tpu.pipeline_mode<synchronous>, transform_indices = @transform_11, window_bounds = array<i64: 1, 128>}, {pipeline_mode = #tpu.pipeline_mode<synchronous>, transform_indices = @transform_12, window_bounds = array<i64: 128, 32>}, {pipeline_mode = #tpu.pipeline_mode<synchronous>, transform_indices = @transform_13, window_bounds = array<i64: 1, 32>}, {pipeline_mode = #tpu.pipeline_mode<synchronous>, transform_indices = @transform_14, window_bounds = array<i64: 1, 32>}, {transform_indices = @transform_15, window_bounds = array<i64: 1, 8, 32>}]} {
    %c0_i32 = arith.constant 0 : i32
    %0 = arith.cmpi eq, %arg1, %c0_i32 : i32
    %1 = arith.extui %0 : i1 to i32
    %c0_i32_0 = arith.constant 0 : i32
    %2 = arith.cmpi ne, %1, %c0_i32_0 : i32
    scf.if %2 {
      %c0_59 = arith.constant 0 : index
      %c0_60 = arith.constant 0 : index
      %146 = vector.load %arg4[%c0_59, %c0_60] : memref<8x32xf32, #tpu.memory_space<vmem>>, vector<8x32xf32>
      %c0_61 = arith.constant 0 : index
      %c0_62 = arith.constant 0 : index
      %147 = vector.load %arg18[%c0_61, %c0_62] : memref<8x32xf32, #tpu.memory_space<vmem>>, vector<8x32xf32>
      tpu.vector_store %arg18[%c0_61, %c0_62], %146 {strides = array<i32>} : memref<8x32xf32, #tpu.memory_space<vmem>>, vector<8x32xf32>,
      %c0_63 = arith.constant 0 : index
      %c0_64 = arith.constant 0 : index
      %c0_65 = arith.constant 0 : index
      %148 = vector.load %arg2[%c0_63, %c0_64, %c0_65] : memref<1x16x32xbf16, #tpu.memory_space<vmem>>, vector<1x16x32xbf16>
      %149 = vector.shape_cast %148 : vector<1x16x32xbf16> to vector<16x32xbf16>
      %c0_66 = arith.constant 0 : index
      %c0_67 = arith.constant 0 : index
      %150 = vector.load %arg7[%c0_66, %c0_67] : memref<32x64xbf16, #tpu.memory_space<vmem>>, vector<32x64xbf16>
      %cst_68 = arith.constant dense<0.000000e+00> : vector<16x64xf32>
      %151 = tpu.matmul %149, %150, %cst_68 {dimension_numbers = #tpu.dot_dimension_numbers<[1], [0], [0], [1], [0, 0, 1, 1], [], []>} : vector<16x32xbf16>, vector<32x64xbf16>, vector<16x64xf32> -> vector<16x64xf32>
      %c0_69 = arith.constant 0 : index
      %c0_70 = arith.constant 0 : index
      %152 = vector.load %arg8[%c0_69, %c0_70] : memref<1x64xf32, #tpu.memory_space<vmem>>, vector<1x64xf32>
      %153 = vector.broadcast %152 : vector<1x64xf32> to vector<16x64xf32>
      %154 = arith.addf %151, %153 : vector<16x64xf32>
      %155 = arith.truncf %154 : vector<16x64xf32> to vector<16x64xbf16>
      %156 = vector.extract_strided_slice %155 {offsets = [0, 0], sizes = [16, 8], strides = [1, 1]} : vector<16x64xbf16> to vector<16x8xbf16>
      %c0_71 = arith.constant 0 : index
      %c0_72 = arith.constant 0 : index
      %c0_73 = arith.constant 0 : index
      %157 = vector.load %arg19[%c0_71, %c0_72, %c0_73] : memref<4x16x8xbf16, #tpu.memory_space<vmem>>, vector<1x16x8xbf16>
      %158 = vector.shape_cast %157 : vector<1x16x8xbf16> to vector<16x8xbf16>
      %159 = vector.shape_cast %156 : vector<16x8xbf16> to vector<1x16x8xbf16>
      tpu.vector_store %arg19[%c0_71, %c0_72, %c0_73], %159 {strides = array<i32>} : memref<4x16x8xbf16, #tpu.memory_space<vmem>>, vector<1x16x8xbf16>,
      %160 = vector.extract_strided_slice %155 {offsets = [0, 32], sizes = [16, 8], strides = [1, 1]} : vector<16x64xbf16> to vector<16x8xbf16>
      %c0_74 = arith.constant 0 : index
      %c0_75 = arith.constant 0 : index
      %c0_76 = arith.constant 0 : index
      %161 = vector.load %arg20[%c0_74, %c0_75, %c0_76] : memref<4x16x8xbf16, #tpu.memory_space<vmem>>, vector<1x16x8xbf16>
      %162 = vector.shape_cast %161 : vector<1x16x8xbf16> to vector<16x8xbf16>
      %163 = vector.shape_cast %160 : vector<16x8xbf16> to vector<1x16x8xbf16>
      tpu.vector_store %arg20[%c0_74, %c0_75, %c0_76], %163 {strides = array<i32>} : memref<4x16x8xbf16, #tpu.memory_space<vmem>>, vector<1x16x8xbf16>,
      %164 = vector.extract_strided_slice %155 {offsets = [0, 8], sizes = [16, 8], strides = [1, 1]} : vector<16x64xbf16> to vector<16x8xbf16>
      %c1 = arith.constant 1 : index
      %c0_77 = arith.constant 0 : index
      %c0_78 = arith.constant 0 : index
      %165 = vector.load %arg19[%c1, %c0_77, %c0_78] : memref<4x16x8xbf16, #tpu.memory_space<vmem>>, vector<1x16x8xbf16>
      %166 = vector.shape_cast %165 : vector<1x16x8xbf16> to vector<16x8xbf16>
      %167 = vector.shape_cast %164 : vector<16x8xbf16> to vector<1x16x8xbf16>
      tpu.vector_store %arg19[%c1, %c0_77, %c0_78], %167 {strides = array<i32>} : memref<4x16x8xbf16, #tpu.memory_space<vmem>>, vector<1x16x8xbf16>,
      %168 = vector.extract_strided_slice %155 {offsets = [0, 40], sizes = [16, 8], strides = [1, 1]} : vector<16x64xbf16> to vector<16x8xbf16>
      %c1_79 = arith.constant 1 : index
      %c0_80 = arith.constant 0 : index
      %c0_81 = arith.constant 0 : index
      %169 = vector.load %arg20[%c1_79, %c0_80, %c0_81] : memref<4x16x8xbf16, #tpu.memory_space<vmem>>, vector<1x16x8xbf16>
      %170 = vector.shape_cast %169 : vector<1x16x8xbf16> to vector<16x8xbf16>
      %171 = vector.shape_cast %168 : vector<16x8xbf16> to vector<1x16x8xbf16>
      tpu.vector_store %arg20[%c1_79, %c0_80, %c0_81], %171 {strides = array<i32>} : memref<4x16x8xbf16, #tpu.memory_space<vmem>>, vector<1x16x8xbf16>,
      %172 = vector.extract_strided_slice %155 {offsets = [0, 16], sizes = [16, 8], strides = [1, 1]} : vector<16x64xbf16> to vector<16x8xbf16>
      %c2 = arith.constant 2 : index
      %c0_82 = arith.constant 0 : index
      %c0_83 = arith.constant 0 : index
      %173 = vector.load %arg19[%c2, %c0_82, %c0_83] : memref<4x16x8xbf16, #tpu.memory_space<vmem>>, vector<1x16x8xbf16>
      %174 = vector.shape_cast %173 : vector<1x16x8xbf16> to vector<16x8xbf16>
      %175 = vector.shape_cast %172 : vector<16x8xbf16> to vector<1x16x8xbf16>
      tpu.vector_store %arg19[%c2, %c0_82, %c0_83], %175 {strides = array<i32>} : memref<4x16x8xbf16, #tpu.memory_space<vmem>>, vector<1x16x8xbf16>,
      %176 = vector.extract_strided_slice %155 {offsets = [0, 48], sizes = [16, 8], strides = [1, 1]} : vector<16x64xbf16> to vector<16x8xbf16>
      %c2_84 = arith.constant 2 : index
      %c0_85 = arith.constant 0 : index
      %c0_86 = arith.constant 0 : index
      %177 = vector.load %arg20[%c2_84, %c0_85, %c0_86] : memref<4x16x8xbf16, #tpu.memory_space<vmem>>, vector<1x16x8xbf16>
      %178 = vector.shape_cast %177 : vector<1x16x8xbf16> to vector<16x8xbf16>
      %179 = vector.shape_cast %176 : vector<16x8xbf16> to vector<1x16x8xbf16>
      tpu.vector_store %arg20[%c2_84, %c0_85, %c0_86], %179 {strides = array<i32>} : memref<4x16x8xbf16, #tpu.memory_space<vmem>>, vector<1x16x8xbf16>,
      %180 = vector.extract_strided_slice %155 {offsets = [0, 24], sizes = [16, 8], strides = [1, 1]} : vector<16x64xbf16> to vector<16x8xbf16>
      %c3 = arith.constant 3 : index
      %c0_87 = arith.constant 0 : index
      %c0_88 = arith.constant 0 : index
      %181 = vector.load %arg19[%c3, %c0_87, %c0_88] : memref<4x16x8xbf16, #tpu.memory_space<vmem>>, vector<1x16x8xbf16>
      %182 = vector.shape_cast %181 : vector<1x16x8xbf16> to vector<16x8xbf16>
      %183 = vector.shape_cast %180 : vector<16x8xbf16> to vector<1x16x8xbf16>
      tpu.vector_store %arg19[%c3, %c0_87, %c0_88], %183 {strides = array<i32>} : memref<4x16x8xbf16, #tpu.memory_space<vmem>>, vector<1x16x8xbf16>,
      %184 = vector.extract_strided_slice %155 {offsets = [0, 56], sizes = [16, 8], strides = [1, 1]} : vector<16x64xbf16> to vector<16x8xbf16>
      %c3_89 = arith.constant 3 : index
      %c0_90 = arith.constant 0 : index
      %c0_91 = arith.constant 0 : index
      %185 = vector.load %arg20[%c3_89, %c0_90, %c0_91] : memref<4x16x8xbf16, #tpu.memory_space<vmem>>, vector<1x16x8xbf16>
      %186 = vector.shape_cast %185 : vector<1x16x8xbf16> to vector<16x8xbf16>
      %187 = vector.shape_cast %184 : vector<16x8xbf16> to vector<1x16x8xbf16>
      tpu.vector_store %arg20[%c3_89, %c0_90, %c0_91], %187 {strides = array<i32>} : memref<4x16x8xbf16, #tpu.memory_space<vmem>>, vector<1x16x8xbf16>,
    } else {
    }
    %c0 = arith.constant 0 : index
    %c0_1 = arith.constant 0 : index
    %3 = vector.load %arg18[%c0, %c0_1] : memref<8x32xf32, #tpu.memory_space<vmem>>, vector<8x32xf32>
    %4 = arith.truncf %3 : vector<8x32xf32> to vector<8x32xbf16>
    %c0_2 = arith.constant 0 : index
    %c0_3 = arith.constant 0 : index
    %5 = vector.load %arg5[%c0_2, %c0_3] : memref<32x32xbf16, #tpu.memory_space<vmem>>, vector<32x32xbf16>
    %cst = arith.constant dense<0.000000e+00> : vector<8x32xf32>
    %6 = tpu.matmul %4, %5, %cst {dimension_numbers = #tpu.dot_dimension_numbers<[1], [0], [0], [1], [0, 0, 1, 1], [], []>} : vector<8x32xbf16>, vector<32x32xbf16>, vector<8x32xf32> -> vector<8x32xf32>
    %c0_4 = arith.constant 0 : index
    %c0_5 = arith.constant 0 : index
    %7 = vector.load %arg6[%c0_4, %c0_5] : memref<1x32xf32, #tpu.memory_space<vmem>>, vector<1x32xf32>
    %8 = vector.broadcast %7 : vector<1x32xf32> to vector<8x32xf32>
    %9 = arith.addf %6, %8 : vector<8x32xf32>
    %cst_6 = arith.constant 1.250000e-01 : f32
    %10 = vector.broadcast %cst_6 : f32 to vector<8x32xf32>
    %11 = arith.mulf %9, %10 : vector<8x32xf32>
    %c0_7 = arith.constant 0 : index
    %c0_8 = arith.constant 0 : index
    %12 = vector.load %arg7[%c0_7, %c0_8] : memref<32x64xbf16, #tpu.memory_space<vmem>>, vector<32x64xbf16>
    %cst_9 = arith.constant dense<0.000000e+00> : vector<8x64xf32>
    %13 = tpu.matmul %4, %12, %cst_9 {dimension_numbers = #tpu.dot_dimension_numbers<[1], [0], [0], [1], [0, 0, 1, 1], [], []>} : vector<8x32xbf16>, vector<32x64xbf16>, vector<8x64xf32> -> vector<8x64xf32>
    %c0_10 = arith.constant 0 : index
    %c0_11 = arith.constant 0 : index
    %14 = vector.load %arg8[%c0_10, %c0_11] : memref<1x64xf32, #tpu.memory_space<vmem>>, vector<1x64xf32>
    %15 = vector.broadcast %14 : vector<1x64xf32> to vector<8x64xf32>
    %16 = arith.addf %13, %15 : vector<8x64xf32>
    %17 = vector.extract_strided_slice %11 {offsets = [0, 0], sizes = [8, 8], strides = [1, 1]} : vector<8x32xf32> to vector<8x8xf32>
    %18 = vector.extract_strided_slice %11 {offsets = [0, 8], sizes = [8, 8], strides = [1, 1]} : vector<8x32xf32> to vector<8x8xf32>
    %19 = vector.extract_strided_slice %11 {offsets = [0, 16], sizes = [8, 8], strides = [1, 1]} : vector<8x32xf32> to vector<8x8xf32>
    %20 = vector.extract_strided_slice %11 {offsets = [0, 24], sizes = [8, 8], strides = [1, 1]} : vector<8x32xf32> to vector<8x8xf32>
    %21 = vector.shape_cast %17 : vector<8x8xf32> to vector<1x8x8xf32>
    %22 = vector.shape_cast %18 : vector<8x8xf32> to vector<1x8x8xf32>
    %23 = vector.shape_cast %19 : vector<8x8xf32> to vector<1x8x8xf32>
    %24 = vector.shape_cast %20 : vector<8x8xf32> to vector<1x8x8xf32>
    %25 = tpu.concatenate %21, %22, %23, %24 in 0 : vector<1x8x8xf32>, vector<1x8x8xf32>, vector<1x8x8xf32>, vector<1x8x8xf32> -> vector<4x8x8xf32>
    %26 = arith.truncf %25 : vector<4x8x8xf32> to vector<4x8x8xbf16>
    %27 = vector.extract_strided_slice %16 {offsets = [0, 0], sizes = [8, 32], strides = [1, 1]} : vector<8x64xf32> to vector<8x32xf32>
    %28 = vector.extract_strided_slice %27 {offsets = [0, 0], sizes = [8, 8], strides = [1, 1]} : vector<8x32xf32> to vector<8x8xf32>
    %29 = vector.extract_strided_slice %27 {offsets = [0, 8], sizes = [8, 8], strides = [1, 1]} : vector<8x32xf32> to vector<8x8xf32>
    %30 = vector.extract_strided_slice %27 {offsets = [0, 16], sizes = [8, 8], strides = [1, 1]} : vector<8x32xf32> to vector<8x8xf32>
    %31 = vector.extract_strided_slice %27 {offsets = [0, 24], sizes = [8, 8], strides = [1, 1]} : vector<8x32xf32> to vector<8x8xf32>
    %32 = vector.shape_cast %28 : vector<8x8xf32> to vector<1x8x8xf32>
    %33 = vector.shape_cast %29 : vector<8x8xf32> to vector<1x8x8xf32>
    %34 = vector.shape_cast %30 : vector<8x8xf32> to vector<1x8x8xf32>
    %35 = vector.shape_cast %31 : vector<8x8xf32> to vector<1x8x8xf32>
    %36 = tpu.concatenate %32, %33, %34, %35 in 0 : vector<1x8x8xf32>, vector<1x8x8xf32>, vector<1x8x8xf32>, vector<1x8x8xf32> -> vector<4x8x8xf32>
    %37 = arith.truncf %36 : vector<4x8x8xf32> to vector<4x8x8xbf16>
    %38 = vector.extract_strided_slice %16 {offsets = [0, 32], sizes = [8, 32], strides = [1, 1]} : vector<8x64xf32> to vector<8x32xf32>
    %39 = vector.extract_strided_slice %38 {offsets = [0, 0], sizes = [8, 8], strides = [1, 1]} : vector<8x32xf32> to vector<8x8xf32>
    %40 = vector.extract_strided_slice %38 {offsets = [0, 8], sizes = [8, 8], strides = [1, 1]} : vector<8x32xf32> to vector<8x8xf32>
    %41 = vector.extract_strided_slice %38 {offsets = [0, 16], sizes = [8, 8], strides = [1, 1]} : vector<8x32xf32> to vector<8x8xf32>
    %42 = vector.extract_strided_slice %38 {offsets = [0, 24], sizes = [8, 8], strides = [1, 1]} : vector<8x32xf32> to vector<8x8xf32>
    %43 = vector.shape_cast %39 : vector<8x8xf32> to vector<1x8x8xf32>
    %44 = vector.shape_cast %40 : vector<8x8xf32> to vector<1x8x8xf32>
    %45 = vector.shape_cast %41 : vector<8x8xf32> to vector<1x8x8xf32>
    %46 = vector.shape_cast %42 : vector<8x8xf32> to vector<1x8x8xf32>
    %47 = tpu.concatenate %43, %44, %45, %46 in 0 : vector<1x8x8xf32>, vector<1x8x8xf32>, vector<1x8x8xf32>, vector<1x8x8xf32> -> vector<4x8x8xf32>
    %48 = arith.truncf %47 : vector<4x8x8xf32> to vector<4x8x8xbf16>
    %c0_12 = arith.constant 0 : index
    %c0_13 = arith.constant 0 : index
    %c0_14 = arith.constant 0 : index
    %49 = vector.load %arg19[%c0_12, %c0_13, %c0_14] : memref<4x16x8xbf16, #tpu.memory_space<vmem>>, vector<4x16x8xbf16>
    %c0_15 = arith.constant 0 : index
    %c0_16 = arith.constant 0 : index
    %c0_17 = arith.constant 0 : index
    %50 = vector.load %arg20[%c0_15, %c0_16, %c0_17] : memref<4x16x8xbf16, #tpu.memory_space<vmem>>, vector<4x16x8xbf16>
    %c0_18 = arith.constant 0 : index
    %c0_19 = arith.constant 0 : index
    %c0_20 = arith.constant 0 : index
    %51 = vector.load %arg3[%c0_18, %c0_19, %c0_20] : memref<1x1x16xf32, #tpu.memory_space<vmem>>, vector<1x1x16xf32>
    %52 = vector.shape_cast %51 : vector<1x1x16xf32> to vector<1x16xf32>
    %cst_21 = arith.constant 5.000000e-01 : f32
    %53 = vector.broadcast %cst_21 : f32 to vector<1x16xf32>
    %54 = arith.cmpf ogt, %52, %53 : vector<1x16xf32>
    %cst_22 = arith.constant 0.000000e+00 : f32
    %cst_23 = arith.constant -1.000000e+30 : f32
    %55 = vector.broadcast %cst_22 : f32 to vector<1x16xf32>
    %56 = vector.broadcast %cst_23 : f32 to vector<1x16xf32>
    %57 = arith.select %54, %55, %56 : vector<1x16xi1>, vector<1x16xf32>
    "tpu.trace_start"() <{level = 10 : i32, message = "hke,hpe->hkp"}> : () -> ()
    %cst_24 = arith.constant dense<0.000000e+00> : vector<4x8x16xf32>
    %58 = tpu.matmul %26, %49, %cst_24 {dimension_numbers = #tpu.dot_dimension_numbers<[2], [2], [1], [1], [0, 0, 0, 1, 1, 1], [0], [0]>} : vector<4x8x8xbf16>, vector<4x16x8xbf16>, vector<4x8x16xf32> -> vector<4x8x16xf32>
    "tpu.trace_stop"() : () -> ()
    %59 = vector.shape_cast %57 : vector<1x16xf32> to vector<1x1x16xf32>
    %60 = vector.broadcast %59 : vector<1x1x16xf32> to vector<4x8x16xf32>
    %61 = arith.addf %58, %60 : vector<4x8x16xf32>
    "tpu.trace_start"() <{level = 10 : i32, message = "hke,hje->hkj"}> : () -> ()
    %cst_25 = arith.constant dense<0.000000e+00> : vector<4x8x8xf32>
    %62 = tpu.matmul %26, %37, %cst_25 {dimension_numbers = #tpu.dot_dimension_numbers<[2], [2], [1], [1], [0, 0, 0, 1, 1, 1], [0], [0]>} : vector<4x8x8xbf16>, vector<4x8x8xbf16>, vector<4x8x8xf32> -> vector<4x8x8xf32>
    "tpu.trace_stop"() : () -> ()
    %cst_26 = arith.constant dense<0xFF800000> : vector<4x8xf32>
    %63 = vector.multi_reduction <maximumf>, %61, %cst_26 [2] : vector<4x8x16xf32> to vector<4x8xf32>
    %64 = vector.shape_cast %63 : vector<4x8xf32> to vector<4x8x1xf32>
    %cst_27 = arith.constant dense<0xFF800000> : vector<4x8xf32>
    %65 = vector.multi_reduction <maximumf>, %62, %cst_27 [2] : vector<4x8x8xf32> to vector<4x8xf32>
    %66 = vector.shape_cast %65 : vector<4x8xf32> to vector<4x8x1xf32>
    %67 = arith.maximumf %64, %66 : vector<4x8x1xf32>
    %68 = vector.broadcast %67 : vector<4x8x1xf32> to vector<4x8x16xf32>
    %69 = arith.subf %61, %68 : vector<4x8x16xf32>
    %70 = math.exp %69 : vector<4x8x16xf32>
    %71 = vector.broadcast %67 : vector<4x8x1xf32> to vector<4x8x8xf32>
    %72 = arith.subf %62, %71 : vector<4x8x8xf32>
    %73 = math.exp %72 : vector<4x8x8xf32>
    %cst_28 = arith.constant dense<0.000000e+00> : vector<4x8xf32>
    %74 = vector.multi_reduction <add>, %70, %cst_28 [2] : vector<4x8x16xf32> to vector<4x8xf32>
    %75 = vector.shape_cast %74 : vector<4x8xf32> to vector<4x8x1xf32>
    %cst_29 = arith.constant dense<0.000000e+00> : vector<4x8xf32>
    %76 = vector.multi_reduction <add>, %73, %cst_29 [2] : vector<4x8x8xf32> to vector<4x8xf32>
    %77 = vector.shape_cast %76 : vector<4x8xf32> to vector<4x8x1xf32>
    %78 = arith.addf %75, %77 : vector<4x8x1xf32>
    %79 = tpu.reciprocal %78 {approx = true} : vector<4x8x1xf32> -> vector<4x8x1xf32>
    %80 = arith.truncf %70 : vector<4x8x16xf32> to vector<4x8x16xbf16>
    "tpu.trace_start"() <{level = 10 : i32, message = "hkp,hpe->hke"}> : () -> ()
    %cst_30 = arith.constant dense<0.000000e+00> : vector<4x8x8xf32>
    %81 = tpu.matmul %80, %50, %cst_30 {dimension_numbers = #tpu.dot_dimension_numbers<[2], [1], [1], [2], [0, 0, 0, 1, 1, 2], [0], [0]>} : vector<4x8x16xbf16>, vector<4x16x8xbf16>, vector<4x8x8xf32> -> vector<4x8x8xf32>
    "tpu.trace_stop"() : () -> ()
    %82 = arith.truncf %73 : vector<4x8x8xf32> to vector<4x8x8xbf16>
    "tpu.trace_start"() <{level = 10 : i32, message = "hkj,hje->hke"}> : () -> ()
    %cst_31 = arith.constant dense<0.000000e+00> : vector<4x8x8xf32>
    %83 = tpu.matmul %82, %48, %cst_31 {dimension_numbers = #tpu.dot_dimension_numbers<[2], [1], [1], [2], [0, 0, 0, 1, 1, 2], [0], [0]>} : vector<4x8x8xbf16>, vector<4x8x8xbf16>, vector<4x8x8xf32> -> vector<4x8x8xf32>
    "tpu.trace_stop"() : () -> ()
    %84 = arith.addf %81, %83 : vector<4x8x8xf32>
    %85 = vector.broadcast %79 : vector<4x8x1xf32> to vector<4x8x8xf32>
    %86 = arith.mulf %84, %85 : vector<4x8x8xf32>
    %87 = vector.extract_strided_slice %86 {offsets = [0, 0, 0], sizes = [1, 8, 8], strides = [1, 1, 1]} : vector<4x8x8xf32> to vector<1x8x8xf32>
    %88 = vector.shape_cast %87 : vector<1x8x8xf32> to vector<8x8xf32>
    %89 = vector.extract_strided_slice %86 {offsets = [1, 0, 0], sizes = [1, 8, 8], strides = [1, 1, 1]} : vector<4x8x8xf32> to vector<1x8x8xf32>
    %90 = vector.shape_cast %89 : vector<1x8x8xf32> to vector<8x8xf32>
    %91 = vector.extract_strided_slice %86 {offsets = [2, 0, 0], sizes = [1, 8, 8], strides = [1, 1, 1]} : vector<4x8x8xf32> to vector<1x8x8xf32>
    %92 = vector.shape_cast %91 : vector<1x8x8xf32> to vector<8x8xf32>
    %93 = vector.extract_strided_slice %86 {offsets = [3, 0, 0], sizes = [1, 8, 8], strides = [1, 1, 1]} : vector<4x8x8xf32> to vector<1x8x8xf32>
    %94 = vector.shape_cast %93 : vector<1x8x8xf32> to vector<8x8xf32>
    %95 = tpu.concatenate %88, %90, %92, %94 in 1 : vector<8x8xf32>, vector<8x8xf32>, vector<8x8xf32>, vector<8x8xf32> -> vector<8x32xf32>
    %96 = arith.truncf %95 : vector<8x32xf32> to vector<8x32xbf16>
    %c0_32 = arith.constant 0 : index
    %c0_33 = arith.constant 0 : index
    %97 = vector.load %arg9[%c0_32, %c0_33] : memref<32x32xbf16, #tpu.memory_space<vmem>>, vector<32x32xbf16>
    %cst_34 = arith.constant dense<0.000000e+00> : vector<8x32xf32>
    %98 = tpu.matmul %96, %97, %cst_34 {dimension_numbers = #tpu.dot_dimension_numbers<[1], [0], [0], [1], [0, 0, 1, 1], [], []>} : vector<8x32xbf16>, vector<32x32xbf16>, vector<8x32xf32> -> vector<8x32xf32>
    %c0_35 = arith.constant 0 : index
    %c0_36 = arith.constant 0 : index
    %99 = vector.load %arg10[%c0_35, %c0_36] : memref<1x32xf32, #tpu.memory_space<vmem>>, vector<1x32xf32>
    %100 = vector.broadcast %99 : vector<1x32xf32> to vector<8x32xf32>
    %101 = arith.addf %98, %100 : vector<8x32xf32>
    %102 = arith.addf %101, %3 : vector<8x32xf32>
    %103 = arith.mulf %102, %102 : vector<8x32xf32>
    %cst_37 = arith.constant dense<0.000000e+00> : vector<8xf32>
    %104 = vector.multi_reduction <add>, %103, %cst_37 [1] : vector<8x32xf32> to vector<8xf32>
    %105 = vector.shape_cast %104 : vector<8xf32> to vector<8x1xf32>
    %cst_38 = arith.constant 3.200000e+01 : f32
    %106 = vector.broadcast %cst_38 : f32 to vector<8x1xf32>
    %107 = arith.divf %105, %106 : vector<8x1xf32>
    %cst_39 = arith.constant 9.99999997E-7 : f32
    %108 = vector.broadcast %cst_39 : f32 to vector<8x1xf32>
    %109 = arith.addf %107, %108 : vector<8x1xf32>
    %110 = math.rsqrt %109 : vector<8x1xf32>
    %111 = vector.broadcast %110 : vector<8x1xf32> to vector<8x32xf32>
    %112 = arith.mulf %102, %111 : vector<8x32xf32>
    %c0_40 = arith.constant 0 : index
    %c0_41 = arith.constant 0 : index
    %113 = vector.load %arg11[%c0_40, %c0_41] : memref<1x32xf32, #tpu.memory_space<vmem>>, vector<1x32xf32>
    %114 = vector.broadcast %113 : vector<1x32xf32> to vector<8x32xf32>
    %115 = arith.mulf %112, %114 : vector<8x32xf32>
    %116 = arith.truncf %115 : vector<8x32xf32> to vector<8x32xbf16>
    %c0_42 = arith.constant 0 : index
    %c0_43 = arith.constant 0 : index
    %117 = vector.load %arg12[%c0_42, %c0_43] : memref<32x128xbf16, #tpu.memory_space<vmem>>, vector<32x128xbf16>
    %cst_44 = arith.constant dense<0.000000e+00> : vector<8x128xf32>
    %118 = tpu.matmul %116, %117, %cst_44 {dimension_numbers = #tpu.dot_dimension_numbers<[1], [0], [0], [1], [0, 0, 1, 1], [], []>} : vector<8x32xbf16>, vector<32x128xbf16>, vector<8x128xf32> -> vector<8x128xf32>
    %c0_45 = arith.constant 0 : index
    %c0_46 = arith.constant 0 : index
    %119 = vector.load %arg13[%c0_45, %c0_46] : memref<1x128xf32, #tpu.memory_space<vmem>>, vector<1x128xf32>
    %120 = vector.broadcast %119 : vector<1x128xf32> to vector<8x128xf32>
    %121 = arith.addf %118, %120 : vector<8x128xf32>
    %122 = arith.mulf %121, %121 : vector<8x128xf32>
    %123 = arith.mulf %121, %122 : vector<8x128xf32>
    %cst_47 = arith.constant 4.471500e-02 : f32
    %124 = vector.broadcast %cst_47 : f32 to vector<8x128xf32>
    %125 = arith.mulf %124, %123 : vector<8x128xf32>
    %126 = arith.addf %121, %125 : vector<8x128xf32>
    %cst_48 = arith.constant 0.797884583 : f32
    %127 = vector.broadcast %cst_48 : f32 to vector<8x128xf32>
    %128 = arith.mulf %127, %126 : vector<8x128xf32>
    %129 = math.tanh %128 : vector<8x128xf32>
    %cst_49 = arith.constant 1.000000e+00 : f32
    %130 = vector.broadcast %cst_49 : f32 to vector<8x128xf32>
    %131 = arith.addf %130, %129 : vector<8x128xf32>
    %cst_50 = arith.constant 5.000000e-01 : f32
    %132 = vector.broadcast %cst_50 : f32 to vector<8x128xf32>
    %133 = arith.mulf %132, %131 : vector<8x128xf32>
    %134 = arith.mulf %121, %133 : vector<8x128xf32>
    %135 = arith.truncf %134 : vector<8x128xf32> to vector<8x128xbf16>
    %c0_51 = arith.constant 0 : index
    %c0_52 = arith.constant 0 : index
    %136 = vector.load %arg14[%c0_51, %c0_52] : memref<128x32xbf16, #tpu.memory_space<vmem>>, vector<128x32xbf16>
    %cst_53 = arith.constant dense<0.000000e+00> : vector<8x32xf32>
    %137 = tpu.matmul %135, %136, %cst_53 {dimension_numbers = #tpu.dot_dimension_numbers<[1], [0], [0], [1], [0, 0, 1, 1], [], []>} : vector<8x128xbf16>, vector<128x32xbf16>, vector<8x32xf32> -> vector<8x32xf32>
    %c0_54 = arith.constant 0 : index
    %c0_55 = arith.constant 0 : index
    %138 = vector.load %arg15[%c0_54, %c0_55] : memref<1x32xf32, #tpu.memory_space<vmem>>, vector<1x32xf32>
    %139 = vector.broadcast %138 : vector<1x32xf32> to vector<8x32xf32>
    %140 = arith.addf %137, %139 : vector<8x32xf32>
    %141 = arith.addf %140, %3 : vector<8x32xf32>
    %c0_56 = arith.constant 0 : index
    %c0_57 = arith.constant 0 : index
    %142 = vector.load %arg18[%c0_56, %c0_57] : memref<8x32xf32, #tpu.memory_space<vmem>>, vector<8x32xf32>
    tpu.vector_store %arg18[%c0_56, %c0_57], %141 {strides = array<i32>} : memref<8x32xf32, #tpu.memory_space<vmem>>, vector<8x32xf32>,
    %c1_i32 = arith.constant 1 : i32
    %143 = arith.cmpi eq, %arg1, %c1_i32 : i32
    %144 = arith.extui %143 : i1 to i32
    %c0_i32_58 = arith.constant 0 : i32
    %145 = arith.cmpi ne, %144, %c0_i32_58 : i32
    scf.if %145 {
      %146 = arith.mulf %141, %141 : vector<8x32xf32>
      %cst_59 = arith.constant dense<0.000000e+00> : vector<8xf32>
      %147 = vector.multi_reduction <add>, %146, %cst_59 [1] : vector<8x32xf32> to vector<8xf32>
      %148 = vector.shape_cast %147 : vector<8xf32> to vector<8x1xf32>
      %cst_60 = arith.constant 3.200000e+01 : f32
      %149 = vector.broadcast %cst_60 : f32 to vector<8x1xf32>
      %150 = arith.divf %148, %149 : vector<8x1xf32>
      %cst_61 = arith.constant 9.99999997E-7 : f32
      %151 = vector.broadcast %cst_61 : f32 to vector<8x1xf32>
      %152 = arith.addf %150, %151 : vector<8x1xf32>
      %153 = math.rsqrt %152 : vector<8x1xf32>
      %154 = vector.broadcast %153 : vector<8x1xf32> to vector<8x32xf32>
      %155 = arith.mulf %141, %154 : vector<8x32xf32>
      %c0_62 = arith.constant 0 : index
      %c0_63 = arith.constant 0 : index
      %156 = vector.load %arg16[%c0_62, %c0_63] : memref<1x32xf32, #tpu.memory_space<vmem>>, vector<1x32xf32>
      %157 = vector.broadcast %156 : vector<1x32xf32> to vector<8x32xf32>
      %158 = arith.mulf %155, %157 : vector<8x32xf32>
      %c0_64 = arith.constant 0 : index
      %c0_65 = arith.constant 0 : index
      %c0_66 = arith.constant 0 : index
      %159 = vector.load %arg17[%c0_64, %c0_65, %c0_66] : memref<1x8x32xf32, #tpu.memory_space<vmem>>, vector<1x8x32xf32>
      %160 = vector.shape_cast %159 : vector<1x8x32xf32> to vector<8x32xf32>
      %161 = vector.shape_cast %158 : vector<8x32xf32> to vector<1x8x32xf32>
      tpu.vector_store %arg17[%c0_64, %c0_65, %c0_66], %161 {strides = array<i32>} : memref<1x8x32xf32, #tpu.memory_space<vmem>>, vector<1x8x32xf32>,
    } else {
    }
    return
  }
  func.func @transform_0(%arg0: i32, %arg1: i32) -> (i32, i32, i32) {
    %c0_i32 = arith.constant 0 : i32
    %c0_i32_0 = arith.constant 0 : i32
    %c0_i32_1 = arith.constant 0 : i32
    return %arg0, %c0_i32, %c0_i32_0 : i32, i32, i32
  }
  func.func @transform_1(%arg0: i32, %arg1: i32) -> (i32, i32, i32) {
    %c0_i32 = arith.constant 0 : i32
    %c0_i32_0 = arith.constant 0 : i32
    %c0_i32_1 = arith.constant 0 : i32
    return %arg0, %c0_i32, %c0_i32_0 : i32, i32, i32
  }
  func.func @transform_2(%arg0: i32, %arg1: i32) -> (i32, i32) {
    %c0_i32 = arith.constant 0 : i32
    %c0_i32_0 = arith.constant 0 : i32
    %c0_i32_1 = arith.constant 0 : i32
    return %c0_i32, %c0_i32_0 : i32, i32
  }
  func.func @transform_3(%arg0: i32, %arg1: i32) -> (i32, i32) {
    %c0_i32 = arith.constant 0 : i32
    %c0_i32_0 = arith.constant 0 : i32
    %c0_i32_1 = arith.constant 0 : i32
    return %c0_i32, %c0_i32_0 : i32, i32
  }
  func.func @transform_4(%arg0: i32, %arg1: i32) -> (i32, i32) {
    %c0_i32 = arith.constant 0 : i32
    %c0_i32_0 = arith.constant 0 : i32
    %c0_i32_1 = arith.constant 0 : i32
    return %c0_i32, %c0_i32_0 : i32, i32
  }
  func.func @transform_5(%arg0: i32, %arg1: i32) -> (i32, i32) {
    %c0_i32 = arith.constant 0 : i32
    %c0_i32_0 = arith.constant 0 : i32
    %c0_i32_1 = arith.constant 0 : i32
    return %c0_i32, %c0_i32_0 : i32, i32
  }
  func.func @transform_6(%arg0: i32, %arg1: i32) -> (i32, i32) {
    %c0_i32 = arith.constant 0 : i32
    %c0_i32_0 = arith.constant 0 : i32
    %c0_i32_1 = arith.constant 0 : i32
    return %c0_i32, %c0_i32_0 : i32, i32
  }
  func.func @transform_7(%arg0: i32, %arg1: i32) -> (i32, i32) {
    %c0_i32 = arith.constant 0 : i32
    %c0_i32_0 = arith.constant 0 : i32
    %c0_i32_1 = arith.constant 0 : i32
    return %c0_i32, %c0_i32_0 : i32, i32
  }
  func.func @transform_8(%arg0: i32, %arg1: i32) -> (i32, i32) {
    %c0_i32 = arith.constant 0 : i32
    %c0_i32_0 = arith.constant 0 : i32
    %c0_i32_1 = arith.constant 0 : i32
    return %c0_i32, %c0_i32_0 : i32, i32
  }
  func.func @transform_9(%arg0: i32, %arg1: i32) -> (i32, i32) {
    %c0_i32 = arith.constant 0 : i32
    %c0_i32_0 = arith.constant 0 : i32
    %c0_i32_1 = arith.constant 0 : i32
    return %c0_i32, %c0_i32_0 : i32, i32
  }
  func.func @transform_10(%arg0: i32, %arg1: i32) -> (i32, i32) {
    %c0_i32 = arith.constant 0 : i32
    %c0_i32_0 = arith.constant 0 : i32
    %c0_i32_1 = arith.constant 0 : i32
    return %c0_i32, %c0_i32_0 : i32, i32
  }
  func.func @transform_11(%arg0: i32, %arg1: i32) -> (i32, i32) {
    %c0_i32 = arith.constant 0 : i32
    %c0_i32_0 = arith.constant 0 : i32
    %c0_i32_1 = arith.constant 0 : i32
    return %c0_i32, %c0_i32_0 : i32, i32
  }
  func.func @transform_12(%arg0: i32, %arg1: i32) -> (i32, i32) {
    %c0_i32 = arith.constant 0 : i32
    %c0_i32_0 = arith.constant 0 : i32
    %c0_i32_1 = arith.constant 0 : i32
    return %c0_i32, %c0_i32_0 : i32, i32
  }
  func.func @transform_13(%arg0: i32, %arg1: i32) -> (i32, i32) {
    %c0_i32 = arith.constant 0 : i32
    %c0_i32_0 = arith.constant 0 : i32
    %c0_i32_1 = arith.constant 0 : i32
    return %c0_i32, %c0_i32_0 : i32, i32
  }
  func.func @transform_14(%arg0: i32, %arg1: i32) -> (i32, i32) {
    %c0_i32 = arith.constant 0 : i32
    %c0_i32_0 = arith.constant 0 : i32
    %c0_i32_1 = arith.constant 0 : i32
    return %c0_i32, %c0_i32_0 : i32, i32
  }
  func.func @transform_15(%arg0: i32, %arg1: i32) -> (i32, i32, i32) {
    %c0_i32 = arith.constant 0 : i32
    %c0_i32_0 = arith.constant 0 : i32
    %c0_i32_1 = arith.constant 0 : i32
    return %arg0, %c0_i32, %c0_i32_0 : i32, i32, i32
  }
}

</mosaic_0001>

<bundles_post_ra>
// kernel: tpu_custom_call.1
= control target key start
LH: loop header
LB: loop body
LE: loop exit
PB: predicated region body
PF: predicated region fallthrough
CT: control target
= control target key end

     0   :  { %s3336_s0 = inlined_call_operand.vmem [shape: bf16[2,16,32], index: 0, kind: input, shape index: {}]   ;;  %s3337_s1 = inlined_call_operand.hbm [shape: f32[2,1,16], index: 1, kind: input, shape index: {}]   ;;  %s3338_s2 = inlined_call_operand.hbm [shape: f32[8,32], index: 2, kind: input, shape index: {}]   ;;  %s3339_s3 = inlined_call_operand.vmem [shape: bf16[32,32], index: 3, kind: input, shape index: {}]   ;;  %s3340_s4 = inlined_call_operand.vmem [shape: f32[1,32], index: 4, kind: input, shape index: {}]   ;;  %s3341_s5 = inlined_call_operand.vmem [shape: bf16[32,64], index: 5, kind: input, shape index: {}]   ;;  %s3342_s6 = inlined_call_operand.vmem [shape: f32[1,64], index: 6, kind: input, shape index: {}]   ;;  %s3343_s7 = inlined_call_operand.vmem [shape: bf16[32,32], index: 7, kind: input, shape index: {}]   ;;  %s3344_s8 = inlined_call_operand.vmem [shape: f32[1,32], index: 8, kind: input, shape index: {}]   ;;  %s3345_s9 = inlined_call_operand.vmem [shape: f32[1,32], index: 9, kind: input, shape index: {}]   ;;  %s3346_s10 = inlined_call_operand.vmem [shape: bf16[32,128], index: 10, kind: input, shape index: {}]   ;;  %s3347_s11 = inlined_call_operand.vmem [shape: f32[1,128], index: 11, kind: input, shape index: {}]   ;;  %s3348_s12 = inlined_call_operand.vmem [shape: bf16[128,32], index: 12, kind: input, shape index: {}]   ;;  %s3349_s13 = inlined_call_operand.vmem [shape: f32[1,32], index: 13, kind: input, shape index: {}]   ;;  %s3350_s14 = inlined_call_operand.vmem [shape: f32[1,32], index: 14, kind: input, shape index: {}]   ;;  %s3351_s15 = inlined_call_operand.hbm [shape: f32[2,8,32], index: 15, kind: output, shape index: {}]  }
   0x1   :  { %3362 = sst [smem:[#allocation21_spill]] %s3338_s2 }
   0x2   :  { %3363 = sst [smem:[#allocation22_spill]] %s3347_s11 }
   0x3   :  { %3364 = sst [smem:[#allocation23_spill]] %s3348_s12 }
   0x4   :  { %3365 = sst [smem:[#allocation24_spill]] %s3349_s13 }
   0x5   :  { %3366 = sst [smem:[#allocation25_spill]] %s3350_s14 }
   0x6   :  { %3367 = sst [smem:[#allocation26_spill]] %s3351_s15 }
   0x7   :  { %20 = vsyncpa [#allocation6], 0 }
   0x8   :  { %22 = vsyncpa [#allocation6 + $0x1], 0 }
   0x9   :  { %23 = vsyncpa [#allocation9], 0 }
   0xa   :  { %24 = vsyncpa [#allocation7], 0 }
   0xb   :  { %26 = vsyncpa [#allocation7 + $0x1], 0  ;;  %s2899_s18 = smov 0   ;;  %s2901_s19 = smov 0  }
   0xc   :  { %s2903_s20 = smov 0   ;;  %s2905_s21 = smov 0  }
   0xd   :  { %s2907_s22 = smov 0   ;;  %s2909_s23 = smov 0  }
   0xe   :  { %s2911_s24 = smov 0   ;;  %s2913_s25 = smov 0  }
   0xf LB: > { %3368 = sst [smem:[#allocation14_spill]] %s2767_s18  ;;  %s2186_s26 = sadd.s32 4294967295, %s2795_s25   ;;  %s2795_s25 = sphi %s2913_s25, %s3401_s25   ;;  %s2791_s24 = sphi %s2911_s24, %s3400_s24   ;;  %s2787_s23 = sphi %s2909_s23, %s3394_s23   ;;  %s2783_s22 = sphi %s2907_s22, %s3399_s22   ;;  %s2779_s21 = sphi %s2905_s21, %s3393_s21   ;;  %s2775_s20 = sphi %s2903_s20, %s3398_s20   ;;  %s2771_s19 = sphi %s2901_s19, %s3397_s19   ;;  %s2767_s18 = sphi %s2899_s18, %s3396_s18  }
  0x10   : > { %3369 = sst [smem:[#allocation15_spill]] %s2787_s23  ;;  %s2187_s27 = sadd.s32 4294967294, %s2795_s25  }
  0x11   : > { %3370 = sst [smem:[#allocation16_spill]] %s2795_s25  ;;  %p90_p0 = scmp.ne.s32.totalorder %s2771_s19, %s2767_s18 }
  0x12   : > { %p2943_p1 = scmp.eq.s32.totalorder %s2186_s26, 0  ;;  %p2947_p2 = scmp.eq.s32.totalorder %s2186_s26, 3 }
  0x13   : > { %p393_p3 = scmp.eq.s32.totalorder %s2187_s27, 3  ;;  %p2188_p5 = scmp.ge.s32.totalorder %s2795_s25, 1 }
  0x14   : > { %p2953_p4 = por %p2943_p1, %p90_p0  ;;  %p400_p7 = scmp.lt.s32.totalorder %s2795_s25, 5 }
  0x15   : > { %p2958_p6 = por %p393_p3, %p90_p0  ;;  %s2797_s26 = smov [#allocation8]  }
  0x16   : > { %p2963_p8 = pnand %p2188_p5, %p400_p7  ;;  %s413_s18 = sshll.u32 %s2797_s26, 4  ;;  %s414_s18 = int_to_ptr.vmem [resolvable:$true] %s413_s18 }
  0x17   : > { %s3374_s16 = scalar_select %p2958_p6, 1, 0 }
  0x18   : > { %p2484_p9 = pneg %p2963_p8  ;;  %s41_s27 = sadd.s32 1, %s2787_s23 }
  0x19   : > { %3375 = sst [smem:[#allocation17_spill]] %s3374_s16  ;;  %s2652_s15 = scalar_lea.vmem %s414_s18, 128 }
  0x1a   : > { %p2485_p10 = pnand %p2484_p9, %p2943_p1  ;;  %p2653_p12 = scmp.ne.s32.totalorder %s414_s18, %s2652_s15 }
  0x1b   : > { %p2660_p3 = scmp.lt.s32.totalorder %s414_s18, %s414_s18  ;;  %p2661_p6 = scmp.lt.s32.totalorder %s2652_s15, %s2652_s15 }
  0x1c   : > { %p2643_p11 = pneg %p2485_p10 }
  0x1d   : > { %p2662_p5 = por %p2661_p6, %p2660_p3 }
  0x1e   : > { %p2655_p13 = pnand %p2653_p12, %p2643_p11 }
  0x20   : > { %p2656_p0 = pneg %p2655_p13 }
  0x22   : > { %p2663_p7 = pnand %p2662_p5, %p2656_p0 }
  0x24   : > { %2666 = shalt.err (!%p2663_p7)
}
  0x25   : > { %s3377_s2 = sld [smem:[#allocation21_spill]]  ;;  %p42_p9 = scmp.ge.s32.totalorder %s41_s27, 2 }
  0x26   : > { %s44_s15 = sadd.s32 1, %s2791_s24  ;;  %s77_s26 = sadd.s32 1, %s2775_s20 }
  0x27   : > { %p84_p6 = scmp.ne.s32.totalorder %s2775_s20, %s2771_s19  ;;  %s3403_s27 = smov (%p42_p9, %s41_s27), 0 }
  0x28   : > { %3378 = sst [smem:[#allocation18_spill]] %s3403_s27  ;;  %s3405_s15 = smov (!%p42_p9, %s44_s15), %s2791_s24 }
  0x29   : > { %p85_p11 = scmp.eq.s32.totalorder %s2795_s25, 0  ;;  %p2985_p12 = por %p2947_p2, %p84_p6 }
  0x2a   : > { %p46_p13 = scmp.ge.s32.totalorder %s3405_s15, 2  ;;  %p2497_p0 = scmp.lt.s32.totalorder %s2795_s25, 4 }
  0x2b   : > { %2487 = dma.hbm_to_vmem [thread:$0]  (!%p2485_p10), %s3377_s2, 128, %s414_s18, [#allocation9]  }
  0x2c   : > { %s3379_s14 = scalar_select %p2985_p12, 1, 0 }
  0x2d   : > { %p86_p3 = por %p85_p11, %p84_p6  ;;  %s468_s16 = sand.u32 1, %s2775_s20  }
  0x2e   : > { %3380 = sst [smem:[#allocation19_spill]] %s3379_s14  ;;  %s3407_s15 = smov (%p46_p13, %s3405_s15), 0 }
  0x2f   : > { %3381 = sst [smem:[#allocation20_spill]] %s3407_s15  ;;  %s74_s18 = ssub.s32 %s2791_s24, %s3407_s15 }
  0x30   : > { %s2191_s2 = sshll.u32 %s2791_s24, 4  ;;  %p75_p10 = scmp.eq.s32.totalorder %s74_s18, 0 }
  0x31   : > { %s476_s13 = scalar_lea.hbm %s3337_s1, %s2191_s2  ;;  %s471_s11 = scalar_lea.vmem [#allocation5], %s468_s16 }
  0x32   : > { %s478_s29 = sshll.u32 %s471_s11, 4  ;;  %p2999_p2 = pnand %p2497_p0, %p86_p3  ;;  %s479_s29 = int_to_ptr.vmem [resolvable:$true] %s478_s29 }
  0x33   : > { %s3004_s25 = scalar_select %p75_p10, %s2775_s20, %s77_s26  }
  0x34   : > { %s469_s14 = scalar_lea.sflag [#allocation6], %s468_s16  ;;  %p2669_p5 = pneg %p2999_p2 }
  0x35   : > { %s2680_s15 = scalar_lea.vmem %s479_s29, 16  ;;  %s2798_s18 = smov [#allocation5]  }
  0x36   : > { %p2681_p7 = scmp.ne.s32.totalorder %s479_s29, %s2680_s15  ;;  %s2685_s23 = sshll.u32 %s2798_s18, 4  ;;  %s2686_s23 = int_to_ptr.vmem [resolvable:$false] %s2685_s23 }
  0x37   : > { %s2687_s2 = scalar_lea.vmem %s2686_s23, 32  ;;  %p2688_p11 = scmp.lt.s32.totalorder %s479_s29, %s2686_s23 }
  0x38   : > { %p2683_p9 = pnand %p2681_p7, %p2669_p5  ;;  %p2689_p13 = scmp.lt.s32.totalorder %s2687_s2, %s2680_s15 }
  0x3a   : > { %p2684_p6 = pneg %p2683_p9  ;;  %p2690_p0 = por %p2689_p13, %p2688_p11 }
  0x3c   : > { %p2691_p3 = pnand %p2690_p0, %p2684_p6 }
  0x3e   : > { %2694 = shalt.err (!%p2691_p3)
}
  0x3f   : > { %2491 = dma.hbm_to_vmem [thread:$0]  (!%p2999_p2), %s476_s13, 16, %s479_s29, %s469_s14  }
  0x40   : > { %487 = sbr.rel (%p2963_p8) target bundleno = 2434 (0x982), region = 80  ;;  %s3013_s11 = sand.u32 (!%p2963_p8), 1, %s2771_s19  }
  0x41   : > { %s490_s27 = scalar_lea.sflag (!%p2963_p8), [#allocation6], %s3013_s11  ;;  %s492_s26 = scalar_lea.vmem (!%p2963_p8), [#allocation5], %s3013_s11 }
  0x45   : > { %2754 = dma.done.wait (%p2953_p4), %s490_s27, 16  }
  0x46   : > { %2756 = vsyncadd (%p2953_p4), %s490_s27, 4294967280 }
  0x47   : > { %2758 = dma.done.wait (%p2943_p1), [#allocation9], 128  }
  0x48   : > { %2760 = vsyncadd (%p2943_p1), [#allocation9], 4294967168  ;;  %s2194_s12 = sshll.u32 %s3013_s11, 3  ;;  %p547_p8 = scmp.lt.s32.totalorder %s2783_s22, 1 }
  0x49   : > { %s3031_s29 = scalar_lea.vmem [#allocation10], %s2194_s12  ;;  %p2197_p4 = scmp.ne.s32.totalorder %s2779_s21, 0 }
  0x4a   : > { %s548_s13 = scalar_select %p547_p8, %s2783_s22, 1 }
  0x4b   : > { %556 = sbr.rel (%p2197_p4) target bundleno = 426 (0x1aa), region = 92  ;;  %s2801_s12 = smov (!%p2197_p4), 120  }
  0x4c   : > { %s2261_s17 = sshll.u32 %s548_s13, 3  ;;  %s2802_s13 = smov (!%p2197_p4), 96  }
  0x4d   : > { %s551_s16 = scalar_lea.vmem %s3336_s0, %s2261_s17  ;;  %s2803_s17 = smov (!%p2197_p4), 88  }
  0x4e   : > { %s2804_s15 = smov (!%p2197_p4), 112   ;;  %s2805_s14 = smov (!%p2197_p4), 80  }
  0x4f   : > { %s2807_s30 = smov (!%p2197_p4), 72  }
  0x50   : > { %v2584_v0 = vld [vmem:[%s3341_s5 + $0x8] sm:$0xff]   ;;  %v2799_v1 = vmov 0.0   ;;  %v2585_v2 = vld [vmem:[%s3341_s5] sm:$0xff]   ;;  %vm2800_vm0 = vmmov 0   ;;  %vm558_vm1 = vcmask 261120   ;;  %vm642_vm2 = vcmask 60416  }
  0x51   : > { %2320 = vmatprep.subr.bf16.mxu0 %v2799_v1  ;;  %2324 = vmatprep.mubr.msk.bf16.mxu0 %vm2800_vm0, %v2799_v1  ;;  %v557_v3 = vld [vmem:[#allocation8] sm:$0xff]  ;;  %v2586_v4 = vld [vmem:[%s551_s16] sm:$0xff]   ;;  %s2806_s16 = smov 104  }
  0x52   : > { %2321 = vmatpush3.bf16.msra.mxu0 %v2584_v0  ;;  %559 = vst.msk [vmem:[#allocation2] sm:$0xff] %vm558_vm1, %v557_v3  ;;  %v2198_v5 = vld [vmem:[%s3342_s6] ss:$0 sm:$0xff] }
  0x53   : > { %2322 = vmatprep.subr.bf16.mxu0 %v2799_v1 }
  0x56   : > { %2323 = vmatpush3.bf16.msra.mxu0 %v2585_v2 }
  0x59   : > { %2325 = vmatmul.mubr.msk.bf16.vlgmr.msra.gmra.mxu0 %vm558_vm1, %v2586_v4 }
 0x119   : > { %v627_v6 = vpop.f32.mrf.mxu0 }
 0x11a   : > { %v628_v7 = vadd.f32 %v2198_v5, %v627_v6 }
 0x11b   : > { %v2326_v8 = vpop.f32.mrf.mxu0 }
 0x11c   : > { %v2262_v9 = vpack.c.bf16 %v628_v7, %v628_v7 }
 0x11d   : > { %v630_v10 = vpop.f32.mrf.mxu0 }
 0x11e   : > { %643 = vst.msk [vmem:[#allocation3] sm:$0xf] %vm642_vm2, %v2262_v9  ;;  %v631_v11 = vadd.f32 %v2198_v5, %v630_v10  ;;  %653 = vrot.lane.b32.xlu1 %v2262_v9, %s2801_s12  ;;  %645 = vrot.lane.b32.xlu0 %v2262_v9, %s2802_s13 }
 0x11f   : > { %v2327_v12 = vpop.f32.mrf.mxu0 }
 0x120   : > { %v2263_v13 = vpack.c.bf16 %v631_v11, %v631_v11 }
 0x122   : > { %644 = vst.msk [vmem:[#allocation3 + $0x4] sm:$0xf] %vm642_vm2, %v2263_v13  ;;  %662 = vrot.lane.b32.xlu0 %v2262_v9, %s2803_s17  ;;  %655 = vrot.lane.b32.xlu1 %v2263_v13, %s2801_s12 }
 0x126   : > { %671 = vrot.lane.b32.xlu0 %v2262_v9, %s2804_s15  ;;  %664 = vrot.lane.b32.xlu1 %v2263_v13, %s2803_s17 }
 0x12a   : > { %680 = vrot.lane.b32.xlu0 %v2262_v9, %s2805_s14  ;;  %673 = vrot.lane.b32.xlu1 %v2263_v13, %s2804_s15 }
 0x12e   : > { %689 = vrot.lane.b32.xlu0 %v2262_v9, %s2806_s16  ;;  %682 = vrot.lane.b32.xlu1 %v2263_v13, %s2805_s14 }
 0x132   : > { %691 = vrot.lane.b32.xlu1 %v2263_v13, %s2806_s16  ;;  %647 = vrot.lane.b32.xlu0 %v2263_v13, %s2802_s13 }
 0x136   : > { %700 = vrot.lane.b32.xlu1 %v2263_v13, %s2807_s30  ;;  %698 = vrot.lane.b32.xlu0 %v2262_v9, %s2807_s30 }
 0x190   : > { %v654_v14 = vpop.permute.xlu1 %653  ;;  %v646_v15 = vpop.permute.xlu0 %645 }
 0x191   : > { %660 = vst.msk [vmem:[#allocation3 + $0x8] sm:$0xf] %vm642_vm2, %v654_v14  ;;  %651 = vst.msk [vmem:[#allocation4] sm:$0xf] %vm642_vm2, %v646_v15 }
 0x194   : > { %v663_v16 = vpop.permute.xlu0 %662  ;;  %v656_v17 = vpop.permute.xlu1 %655 }
 0x195   : > { %669 = vst.msk [vmem:[#allocation4 + $0x8] sm:$0xf] %vm642_vm2, %v663_v16  ;;  %661 = vst.msk [vmem:[#allocation3 + $0xc] sm:$0xf] %vm642_vm2, %v656_v17 }
 0x198   : > { %v672_v18 = vpop.permute.xlu0 %671  ;;  %v665_v19 = vpop.permute.xlu1 %664 }
 0x199   : > { %678 = vst.msk [vmem:[#allocation3 + $0x10] sm:$0xf] %vm642_vm2, %v672_v18  ;;  %670 = vst.msk [vmem:[#allocation4 + $0xc] sm:$0xf] %vm642_vm2, %v665_v19 }
 0x19c   : > { %v681_v20 = vpop.permute.xlu0 %680  ;;  %v674_v21 = vpop.permute.xlu1 %673 }
 0x19d   : > { %687 = vst.msk [vmem:[#allocation4 + $0x10] sm:$0xf] %vm642_vm2, %v681_v20  ;;  %679 = vst.msk [vmem:[#allocation3 + $0x14] sm:$0xf] %vm642_vm2, %v674_v21 }
 0x1a0   : > { %v690_v22 = vpop.permute.xlu0 %689  ;;  %v683_v23 = vpop.permute.xlu1 %682 }
 0x1a1   : > { %696 = vst.msk [vmem:[#allocation3 + $0x18] sm:$0xf] %vm642_vm2, %v690_v22  ;;  %688 = vst.msk [vmem:[#allocation4 + $0x14] sm:$0xf] %vm642_vm2, %v683_v23 }
 0x1a4   : > { %v692_v24 = vpop.permute.xlu1 %691  ;;  %v648_v25 = vpop.permute.xlu0 %647 }
 0x1a5   : > { %697 = vst.msk [vmem:[#allocation3 + $0x1c] sm:$0xf] %vm642_vm2, %v692_v24  ;;  %652 = vst.msk [vmem:[#allocation4 + $0x4] sm:$0xf] %vm642_vm2, %v648_v25 }
 0x1a8   : > { %v701_v26 = vpop.permute.xlu1 %700  ;;  %v699_v27 = vpop.permute.xlu0 %698 }
 0x1a9   : > { %706 = vst.msk [vmem:[#allocation4 + $0x1c] sm:$0xf] %vm642_vm2, %v701_v26  ;;  %705 = vst.msk [vmem:[#allocation4 + $0x18] sm:$0xf] %vm642_vm2, %v699_v27 }
 0x1aa PF: > { %v2587_v28 = vld [vmem:[%s3339_s3 + $0x8] sm:$0xff]   ;;  %v2808_v29 = vmov 0.0   ;;  %v2588_v30 = vld [vmem:[%s3339_s3] sm:$0xff]   ;;  %vm2809_vm3 = vmmov 0   ;;  %vm732_vm4 = vcmask 261120   ;;  %vm898_vm5 = vcmask 64512  }
 0x1ab   : > { %2328 = vmatprep.subr.bf16.mxu1 %v2808_v29  ;;  %2356 = vmatprep.subr.bf16.mxu0 %v2808_v29  ;;  %v3069_v31 = vld [vmem:[#allocation2] sm:$0xff]  ;;  %v2589_v32 = vld [vmem:[%s3341_s5 + $0x8] sm:$0xff]   ;;  %v2593_v37 = vld [vmem:[#allocation3 + $0x10] sm:$0xff]   ;;  %s2810_s16 = smov 104   ;;  %s2811_s30 = smov 120   ;;  %vm1369_vm6 = vcmask 1043456   ;;  %v888_v12 = vlaneseq }
 0x1ac   : > { %2329 = vmatpush3.bf16.msra.mxu1 %v2587_v28  ;;  %2332 = vmatprep.mubr.msk.bf16.mxu1 %vm2809_vm3, %v2808_v29  ;;  %v708_v33 = vpack.c.bf16 %v3069_v31, %v3069_v31  ;;  %v2590_v34 = vld [vmem:[%s3341_s5] sm:$0xff]   ;;  %v2591_v35 = vld [vmem:[#allocation3] sm:$0xff]   ;;  %v1005_v38 = vsel %vm898_vm5, %v2593_v37, 0  ;;  %v2592_v42 = vld [vmem:[#allocation3 + $0x8] sm:$0xff]   ;;  %s2812_s23 = smov 112   ;;  %s2813_s2 = smov 96  }
 0x1ad   : > { %2330 = vmatprep.subr.bf16.mxu1 %v2808_v29  ;;  %2358 = vmatprep.mubr.msk.bf16.mxu0 %vm2809_vm3, %v2808_v29  ;;  %v903_v36 = vsel %vm898_vm5, %v2591_v35, 0  ;;  %v2205_v39 = vld [vmem:[%s3340_s4] ss:$0 sm:$0xff]  ;;  %v954_v47 = vsel %vm898_vm5, %v2592_v42, 0  ;;  %v889_v14 = vshrl.u32 %v888_v12, 7  ;;  %vm1270_vm8 = vcmask 130048  }
 0x1ae   : > { %2357 = vmatpush3.bf16.xpose.msra.mxu0 %v1005_v38  ;;  %v2209_v49 = vld [vmem:[%s3342_s6] ss:$0 sm:$0xff]  ;;  %v2814_v16 = vmov -1e+30   ;;  %s2815_s17 = smov 8   ;;  %s2816_s15 = smov 16  }
 0x1af   : > { %2368 = vmatprep.subr.bf16.mxu0 %v2808_v29  ;;  %v2594_v56 = vld [vmem:[#allocation3 + $0x18] sm:$0xff]   ;;  %v890_v15 = vsub.s32 0, %v889_v14  ;;  %s2817_s14 = smov 24   ;;  %vm1774_vm9 = vcmask 195584   ;;  %s3384_s18 = sld [smem:[#allocation22_spill]] }
 0x1b0   : > { %2331 = vmatpush3.bf16.msra.mxu1 %v2588_v30  ;;  %v1056_v59 = vsel %vm898_vm5, %v2594_v56, 0  ;;  %v884_v13 = vld [vmem:[%s492_s26] sm:$0x1]  ;;  %p2255_p1 = scmp.ne.s32.totalorder %s2779_s21, 1 }
 0x1b1   : > { %2336 = vmatprep.subr.bf16.mxu1 %v2808_v29  ;;  %vm885_vm7 = vcmp.gt.f32.partialorder %v884_v13, 0.5  ;;  %s3386_s12 = sld [smem:[#allocation25_spill]] (!%p2255_p1) }
 0x1b2   : > { %v886_v17 = vsel %vm885_vm7, 0.0, %v2814_v16 }
 0x1b3   : > { %2333 = vmatmul.mubr.msk.bf16.vlgmr.msra.gmra.mxu1 %vm732_vm4, %v708_v33  ;;  %v891_v18 = vrot.slane %v886_v17, %v890_v15 }
 0x1b4   : > { %2337 = vmatpush3.bf16.msra.mxu1 %v2589_v32  ;;  %2340 = vmatprep.mubr.msk.bf16.mxu1 %vm2809_vm3, %v2808_v29 }
 0x1b5   : > { %2338 = vmatprep.subr.bf16.mxu1 %v2808_v29 }
 0x1b8   : > { %2339 = vmatpush3.bf16.msra.mxu1 %v2590_v34 }
 0x1b9   : > { %2344 = vmatprep.subr.bf16.mxu1 %v2808_v29 }
 0x1bb   : > { %2341 = vmatmul.mubr.msk.bf16.vlgmr.msra.gmra.mxu1 %vm732_vm4, %v708_v33 }
 0x1bc   : > { %2346 = vmatprep.mubr.msk.bf16.mxu1 %vm2809_vm3, %v2808_v29  ;;  %2345 = vmatpush3.bf16.xpose.msra.mxu1 %v903_v36 }
 0x1bd   : > { %2350 = vmatprep.subr.bf16.mxu1 %v2808_v29 }
 0x273   : > { %v770_v40 = vpop.f32.mrf.mxu1 }
 0x274   : > { %v771_v41 = vadd.f32 %v2205_v39, %v770_v40 }
 0x275   : > { %v2334_v43 = vpop.f32.mrf.mxu1 }
 0x276   : > { %v776_v44 = vmul.f32 0.125, %v771_v41 }
 0x277   : > { %v773_v45 = vpop.f32.mrf.mxu1 }
 0x278   : > { %v850_v46 = vpack.c.bf16 %v776_v44, %v776_v44  ;;  %847 = vrot.lane.b32.xlu1 %v776_v44, %s2810_s16  ;;  %841 = vrot.lane.b32.xlu0 %v776_v44, %s2811_s30 }
 0x279   : > { %v2335_v48 = vpop.f32.mrf.mxu1 }
 0x27a   : > { %2347 = vmatmul.mubr.msk.bf16.vlgmr.msra.gmra.mxu1 %vm898_vm5, %v850_v46 }
 0x27b   : > { %v834_v50 = vpop.f32.mrf.mxu1  ;;  %2351 = vmatpush3.bf16.xpose.msra.mxu1 %v954_v47  ;;  %2352 = vmatprep.mubr.msk.bf16.mxu1 %vm2809_vm3, %v2808_v29 }
 0x27c   : > { %v835_v51 = vadd.f32 %v2209_v49, %v834_v50  ;;  %844 = vrot.lane.b32.xlu0 %v776_v44, %s2812_s23  ;;  %2362 = vmatprep.subr.bf16.mxu1 %v2808_v29 }
 0x27d   : > { %v2342_v52 = vpop.f32.mrf.mxu1 }
 0x27e   : > { %855 = vrot.lane.b32.xlu1 %v835_v51, %s2811_s30  ;;  %v864_v55 = vpack.c.bf16 %v835_v51, %v835_v51 }
 0x27f   : > { %v837_v53 = vpop.f32.mrf.mxu1 }
 0x280   : > { %858 = vrot.lane.b32.xlu0 %v835_v51, %s2812_s23  ;;  %v1099_v1 = vsel %vm898_vm5, %v864_v55, 0 }
 0x281   : > { %v2343_v54 = vpop.f32.mrf.mxu1 }
 0x282   : > { %861 = vrot.lane.b32.xlu1 %v835_v51, %s2810_s16 }
 0x286   : > { %1364 = vrot.lane.b32.xlu1 %v864_v55, %s2813_s2 }
 0x2ea   : > { %v842_v57 = vpop.permute.xlu0 %841  ;;  %v848_v60 = vpop.permute.xlu1 %847 }
 0x2eb   : > { %v851_v58 = vpack.c.bf16 %v842_v57, %v842_v57  ;;  %v853_v3 = vpack.c.bf16 %v848_v60, %v848_v60 }
 0x2ed   : > { %2353 = vmatmul.mubr.msk.bf16.vlgmr.msra.gmra.mxu1 %vm898_vm5, %v851_v58 }
 0x2ee   : > { %2363 = vmatpush3.bf16.xpose.msra.mxu1 %v1056_v59  ;;  %v845_v61 = vpop.permute.xlu0 %844  ;;  %2364 = vmatprep.mubr.msk.bf16.mxu1 %vm2809_vm3, %v2808_v29 }
 0x2ef   : > { %v852_v62 = vpack.c.bf16 %v845_v61, %v845_v61  ;;  %2374 = vmatprep.subr.bf16.mxu1 %v2808_v29 }
 0x2f0   : > { %v856_v63 = vpop.permute.xlu1 %855 }
 0x2f1   : > { %v3112_v0 = vpack.c.bf16 %v856_v63, %v856_v63  ;;  %2359 = vmatmul.mubr.msk.bf16.vlgmr.msra.gmra.mxu0 %vm898_vm5, %v852_v62 }
 0x2f2   : > { %2369 = vmatpush3.bf16.xpose.msra.mxu0 %v1099_v1  ;;  %v859_v2 = vpop.permute.xlu0 %858  ;;  %2370 = vmatprep.mubr.msk.bf16.mxu0 %vm2809_vm3, %v2808_v29 }
 0x2f3   : > { %v1142_v4 = vsel %vm898_vm5, %v3112_v0, 0  ;;  %2380 = vmatprep.subr.bf16.mxu0 %v2808_v29  ;;  %v3121_v5 = vpack.c.bf16 %v859_v2, %v859_v2 }
 0x2f4   : > { %v862_v6 = vpop.permute.xlu1 %861 }
 0x2f5   : > { %2365 = vmatmul.mubr.msk.bf16.vlgmr.msra.gmra.mxu1 %vm898_vm5, %v853_v3  ;;  %v1185_v7 = vsel %vm898_vm5, %v3121_v5, 0  ;;  %v3129_v8 = vpack.c.bf16 %v862_v6, %v862_v6 }
 0x2f6   : > { %2375 = vmatpush3.bf16.xpose.msra.mxu1 %v1142_v4  ;;  %2376 = vmatprep.mubr.msk.bf16.mxu1 %vm2809_vm3, %v2808_v29 }
 0x2f7   : > { %2386 = vmatprep.subr.bf16.mxu1 %v2808_v29  ;;  %v1228_v9 = vsel %vm898_vm5, %v3129_v8, 0 }
 0x2f8   : > { %v1365_v10 = vpop.permute.xlu1 %1364 }
 0x2f9   : > { %2371 = vmatmul.mubr.msk.bf16.vlgmr.msra.gmra.mxu0 %vm898_vm5, %v850_v46  ;;  %v1371_v11 = vsel %vm1369_vm6, %v1365_v10, 0 }
 0x2fa   : > { %2381 = vmatpush3.bf16.xpose.msra.mxu0 %v1185_v7  ;;  %2382 = vmatprep.mubr.msk.bf16.mxu0 %vm2809_vm3, %v2808_v29 }
 0x2fb   : > { %2392 = vmatprep.subr.bf16.mxu0 %v2808_v29 }
 0x2fd   : > { %2377 = vmatmul.mubr.msk.bf16.vlgmr.msra.gmra.mxu1 %vm898_vm5, %v851_v58 }
 0x2fe   : > { %2387 = vmatpush3.bf16.xpose.msra.mxu1 %v1228_v9  ;;  %2388 = vmatprep.mubr.msk.bf16.mxu1 %vm2809_vm3, %v2808_v29 }
 0x2ff   : > { %2398 = vmatprep.subr.bf16.mxu1 %v2808_v29 }
 0x301   : > { %2383 = vmatmul.mubr.msk.bf16.vlgmr.msra.gmra.mxu0 %vm898_vm5, %v852_v62 }
 0x302   : > { %2393 = vmatpush3.bf16.msra.mxu0 %v1371_v11  ;;  %2394 = vmatprep.mubr.msk.bf16.mxu0 %vm2809_vm3, %v2808_v29 }
 0x303   : > { %2404 = vmatprep.subr.bf16.mxu0 %v2808_v29 }
 0x305   : > { %2389 = vmatmul.mubr.msk.bf16.vlgmr.msra.gmra.mxu1 %vm898_vm5, %v853_v3 }
 0x306   : > { %2400 = vmatprep.mubr.msk.bf16.mxu1 %vm2809_vm3, %v2808_v29 }
 0x33a   : > { %v939_v19 = vpop.f32.mrf.mxu1 }
 0x33b   : > { %v3151_v20 = vadd.f32 %v939_v19, %v891_v18 }
 0x33c   : > { %v2348_v21 = vpop.f32.mrf.mxu1 }
 0x33d   : > { %v1271_v22 = vsel %vm1270_vm8, %v3151_v20, -inf }
 0x33e   : > { %1272 = vmax.xlane.f32.xlu0 %v1271_v22  ;;  %v942_v23 = vpop.f32.mrf.mxu1 }
 0x340   : > { %v2349_v24 = vpop.f32.mrf.mxu1 }
 0x3ad   : > { %v990_v25 = vpop.f32.mrf.mxu1 }
 0x3ae   : > { %v991_v26 = vadd.f32 %v990_v25, %v891_v18 }
 0x3af   : > { %v2354_v27 = vpop.f32.mrf.mxu1 }
 0x3b0   : > { %v1274_v28 = vsel %vm1270_vm8, %v991_v26, -inf }
 0x3b1   : > { %v1041_v30 = vpop.f32.mrf.mxu0  ;;  %1275 = vmax.xlane.f32.xlu0 %v1274_v28  ;;  %v993_v32 = vpop.f32.mrf.mxu1 }
 0x3b2   : > { %v3156_v33 = vadd.f32 %v1041_v30, %v891_v18 }
 0x3b3   : > { %v2355_v34 = vpop.f32.mrf.mxu1  ;;  %v2360_v35 = vpop.f32.mrf.mxu0 }
 0x3b4   : > { %v1277_v36 = vsel %vm1270_vm8, %v3156_v33, -inf }
 0x3b5   : > { %v1044_v37 = vpop.f32.mrf.mxu0  ;;  %1278 = vmax.xlane.f32.xlu1 %v1277_v36  ;;  %v1092_v38 = vpop.f32.mrf.mxu1 }
 0x3b6   : > { %v1093_v43 = vadd.f32 %v1092_v38, %v891_v18 }
 0x3b7   : > { %v2361_v39 = vpop.f32.mrf.mxu0  ;;  %v2366_v40 = vpop.f32.mrf.mxu1 }
 0x3b8   : > { %v1280_v49 = vsel %vm1270_vm8, %v1093_v43, -inf }
 0x3b9   : > { %v1095_v41 = vpop.f32.mrf.mxu1  ;;  %v1135_v42 = vpop.f32.mrf.mxu0 }
 0x3ba   : > { %v1283_v44 = vsel %vm898_vm5, %v1135_v42, -inf }
 0x3bb   : > { %1284 = vmax.xlane.f32.xlu1 %v1283_v44  ;;  %v2367_v45 = vpop.f32.mrf.mxu1  ;;  %v2372_v46 = vpop.f32.mrf.mxu0 }
 0x3bd   : > { %v1138_v47 = vpop.f32.mrf.mxu0  ;;  %v1178_v48 = vpop.f32.mrf.mxu1 }
 0x3be   : > { %v1286_v50 = vsel %vm898_vm5, %v1178_v48, -inf  ;;  %v2595_v47 = vld [vmem:[#allocation4] sm:$0xff]  }
 0x3bf   : > { %v2373_v51 = vpop.f32.mrf.mxu0  ;;  %1281 = vmax.xlane.f32.xlu1 %v1280_v49  ;;  %1287 = vmax.xlane.f32.xlu0 %v1286_v50  ;;  %v2378_v52 = vpop.f32.mrf.mxu1 }
 0x3c1   : > { %v1181_v53 = vpop.f32.mrf.mxu1  ;;  %v1221_v54 = vpop.f32.mrf.mxu0 }
 0x3c2   : > { %v1289_v55 = vsel %vm898_vm5, %v1221_v54, -inf  ;;  %v2596_v53 = vld [vmem:[#allocation4 + $0x8] sm:$0xff]  }
 0x3c3   : > { %v2384_v56 = vpop.f32.mrf.mxu0  ;;  %1290 = vmax.xlane.f32.xlu0 %v1289_v55  ;;  %v2379_v57 = vpop.f32.mrf.mxu1 }
 0x3c5   : > { %v1224_v58 = vpop.f32.mrf.mxu0  ;;  %v1264_v59 = vpop.f32.mrf.mxu1 }
 0x3c6   : > { %v1292_v60 = vsel %vm898_vm5, %v1264_v59, -inf  ;;  %v2597_v58 = vld [vmem:[#allocation4 + $0x10] sm:$0xff]  }
 0x3c7   : > { %v2385_v61 = vpop.f32.mrf.mxu0  ;;  %1293 = vmax.xlane.f32.xlu0 %v1292_v60  ;;  %v2390_v62 = vpop.f32.mrf.mxu1 }
 0x3c8   : > { %v1273_v2 = vpop.xlane.xlu0 %1272  ;;  %v2598_v61 = vld [vmem:[#allocation4 + $0x18] sm:$0xff]  }
 0x3c9   : > { %v1267_v63 = vpop.f32.mrf.mxu1 }
 0x3cb   : > { %v2391_v1 = vpop.f32.mrf.mxu1 }
 0x3d0   : > { %1463 = vrot.lane.b32.xlu1 %v3121_v5, %s2813_s2 }
 0x3d4   : > { %1512 = vrot.lane.b32.xlu1 %v3129_v8, %s2813_s2 }
 0x3dd   : > { %1414 = vrot.lane.b32.xlu0 %v3112_v0, %s2813_s2  ;;  %s3385_s2 = sld [smem:[#allocation24_spill]] }
 0x43a   : > { %v1276_v4 = vpop.xlane.xlu0 %1275 }
 0x43e   : > { %v1279_v3 = vpop.xlane.xlu1 %1278 }
 0x444   : > { %v1285_v6 = vpop.xlane.xlu1 %1284 }
 0x445   : > { %v1295_v7 = vmax.f32 %v1273_v2, %v1285_v6 }
 0x447   : > { %v1311_v9 = vsub.f32 %v1135_v42, %v1295_v7  ;;  %v1299_v18 = vsub.f32 %v3151_v20, %v1295_v7 }
 0x448   : > { %v1288_v10 = vpop.xlane.xlu0 %1287  ;;  %v1282_v19 = vpop.xlane.xlu1 %1281 }
 0x449   : > { %v1315_v11 = vmul.f32 1.442695, %v1311_v9  ;;  %v1296_v12 = vmax.f32 %v1276_v4, %v1288_v10  ;;  %v1303_v27 = vmul.f32 1.442695, %v1299_v18 }
 0x44b   : > { %v1300_v13 = vsub.f32 %v991_v26, %v1296_v12  ;;  %v1312_v14 = vsub.f32 %v1178_v48, %v1296_v12  ;;  %2611 = vpow2.f32 %v1315_v11 }
 0x44c   : > { %v1291_v15 = vpop.xlane.xlu0 %1290 }
 0x44d   : > { %v1305_v5 = vmul.f32 1.442695, %v1300_v13  ;;  %v1317_v16 = vmul.f32 1.442695, %v1312_v14  ;;  %v1297_v17 = vmax.f32 %v1279_v3, %v1291_v15 }
 0x44f   : > { %2613 = vpow2.f32 %v1305_v5  ;;  %v1301_v8 = vsub.f32 %v3156_v33, %v1297_v17  ;;  %v1313_v0 = vsub.f32 %v1221_v54, %v1297_v17  ;;  %v1464_v33 = vpop.permute.xlu1 %1463 }
 0x450   : > { %2615 = vpow2.f32 %v1317_v16  ;;  %v1294_v21 = vpop.xlane.xlu0 %1293  ;;  %v1469_v37 = vsel %vm1369_vm6, %v1464_v33, 0 }
 0x451   : > { %v1307_v22 = vmul.f32 1.442695, %v1301_v8  ;;  %v1319_v23 = vmul.f32 1.442695, %v1313_v0  ;;  %v1298_v24 = vmax.f32 %v1282_v19, %v1294_v21 }
 0x453   : > { %2617 = vpow2.f32 %v1307_v22  ;;  %v1302_v25 = vsub.f32 %v1093_v43, %v1298_v24  ;;  %v1314_v26 = vsub.f32 %v1264_v59, %v1298_v24  ;;  %v1513_v39 = vpop.permute.xlu1 %1512  ;;  %v2599_v22 = vld [vmem:[%s3343_s7 + $0x8] sm:$0xff]  }
 0x454   : > { %2619 = vpow2.f32 %v1319_v23  ;;  %v1415_v28 = vpop.permute.xlu0 %1414  ;;  %v1518_v44 = vsel %vm1369_vm6, %v1513_v39, 0 }
 0x455   : > { %v1309_v30 = vmul.f32 1.442695, %v1302_v25  ;;  %v1321_v32 = vmul.f32 1.442695, %v1314_v26  ;;  %v1420_v34 = vsel %vm1369_vm6, %v1415_v28, 0  ;;  %v2600_v28 = vld [vmem:[%s3343_s7] sm:$0xff]  }
 0x456   : > { %2399 = vmatpush3.bf16.msra.mxu1 %v1420_v34 }
 0x457   : > { %2621 = vpow2.f32 %v1309_v30  ;;  %2410 = vmatprep.subr.bf16.mxu1 %v2808_v29 }
 0x458   : > { %2623 = vpow2.f32 %v1321_v32  ;;  %v2612_v20 = vpop.eup %2611 }
 0x459   : > { %2625 = vpow2.f32 %v1303_v27  ;;  %v1359_v35 = vpack.c.bf16 %v2612_v20, %v2612_v20  ;;  %v1335_v60 = vsel %vm898_vm5, %v2612_v20, 0.0 }
 0x45b   : > { %2395 = vmatmul.mubr.msk.bf16.vlgmr.msra.gmra.mxu0 %vm898_vm5, %v1359_v35 }
 0x45c   : > { %v2614_v36 = vpop.eup %2613  ;;  %2405 = vmatpush3.bf16.msra.mxu0 %v1469_v37  ;;  %2406 = vmatprep.mubr.msk.bf16.mxu0 %vm2809_vm3, %v2808_v29 }
 0x45d   : > { %v2616_v38 = vpop.eup %2615  ;;  %v1326_v40 = vsel %vm1270_vm8, %v2614_v36, 0.0  ;;  %2416 = vmatprep.subr.bf16.mxu0 %v2808_v29  ;;  %v1356_v62 = vpack.c.bf16 %v2614_v36, %v2614_v36 }
 0x45e   : > { %v1338_v41 = vsel %vm898_vm5, %v2616_v38, 0.0  ;;  %1327 = vadd.xlane.f32.xlu0 %v1326_v40  ;;  %v1360_v42 = vpack.c.bf16 %v2616_v38, %v2616_v38 }
 0x45f   : > { %1339 = vadd.xlane.f32.xlu1 %v1338_v41 }
 0x460   : > { %v2618_v43 = vpop.eup %2617  ;;  %2401 = vmatmul.mubr.msk.bf16.vlgmr.msra.gmra.mxu1 %vm898_vm5, %v1360_v42 }
 0x461   : > { %v2620_v45 = vpop.eup %2619  ;;  %2411 = vmatpush3.bf16.msra.mxu1 %v1518_v44  ;;  %v1329_v46 = vsel %vm1270_vm8, %v2618_v43, 0.0  ;;  %2412 = vmatprep.mubr.msk.bf16.mxu1 %vm2809_vm3, %v2808_v29  ;;  %v1357_v63 = vpack.c.bf16 %v2618_v43, %v2618_v43 }
 0x462   : > { %1330 = vadd.xlane.f32.xlu0 %v1329_v46  ;;  %v1361_v48 = vpack.c.bf16 %v2620_v45, %v2620_v45  ;;  %2422 = vmatprep.subr.bf16.mxu1 %v2808_v29  ;;  %v1341_v51 = vsel %vm898_vm5, %v2620_v45, 0.0 }
 0x464   : > { %v2622_v49 = vpop.eup %2621  ;;  %2407 = vmatmul.mubr.msk.bf16.vlgmr.msra.gmra.mxu0 %vm898_vm5, %v1361_v48 }
 0x465   : > { %v2624_v50 = vpop.eup %2623  ;;  %2417 = vmatpush3.bf16.msra.mxu0 %v2595_v47  ;;  %v1332_v52 = vsel %vm1270_vm8, %v2622_v49, 0.0  ;;  %2418 = vmatprep.mubr.msk.bf16.mxu0 %vm2809_vm3, %v2808_v29  ;;  %v1358_v1 = vpack.c.bf16 %v2622_v49, %v2622_v49 }
 0x466   : > { %v2626_v54 = vpop.eup %2625  ;;  %1342 = vadd.xlane.f32.xlu0 %v1341_v51  ;;  %1333 = vadd.xlane.f32.xlu1 %v1332_v52  ;;  %v1362_v55 = vpack.c.bf16 %v2624_v50, %v2624_v50  ;;  %v1344_v56 = vsel %vm898_vm5, %v2624_v50, 0.0 }
 0x467   : > { %2428 = vmatprep.subr.bf16.mxu0 %v2808_v29  ;;  %v1323_v57 = vsel %vm1270_vm8, %v2626_v54, 0.0  ;;  %v1355_v59 = vpack.c.bf16 %v2626_v54, %v2626_v54 }
 0x468   : > { %2413 = vmatmul.mubr.msk.bf16.vlgmr.msra.gmra.mxu1 %vm898_vm5, %v1362_v55 }
 0x469   : > { %2423 = vmatpush3.bf16.msra.mxu1 %v2596_v53  ;;  %2424 = vmatprep.mubr.msk.bf16.mxu1 %vm2809_vm3, %v2808_v29 }
 0x46a   : > { %1345 = vadd.xlane.f32.xlu0 %v1344_v56  ;;  %1324 = vadd.xlane.f32.xlu1 %v1323_v57 }
 0x46b   : > { %2434 = vmatprep.subr.bf16.mxu1 %v2808_v29 }
 0x46c   : > { %2419 = vmatmul.mubr.msk.bf16.vlgmr.msra.gmra.mxu0 %vm1270_vm8, %v1355_v59 }
 0x46d   : > { %2429 = vmatpush3.bf16.msra.mxu0 %v2597_v58  ;;  %2430 = vmatprep.mubr.msk.bf16.mxu0 %vm2809_vm3, %v2808_v29 }
 0x46e   : > { %1336 = vadd.xlane.f32.xlu0 %v1335_v60  ;;  %2440 = vmatprep.subr.bf16.mxu0 %v2808_v29 }
 0x470   : > { %2425 = vmatmul.mubr.msk.bf16.vlgmr.msra.gmra.mxu1 %vm1270_vm8, %v1356_v62 }
 0x471   : > { %2435 = vmatpush3.bf16.msra.mxu1 %v2598_v61  ;;  %2436 = vmatprep.mubr.msk.bf16.mxu1 %vm2809_vm3, %v2808_v29 }
 0x472   : > { %2448 = vmatprep.subr.bf16.mxu1 %v2808_v29 }
 0x474   : > { %2431 = vmatmul.mubr.msk.bf16.vlgmr.msra.gmra.mxu0 %vm1270_vm8, %v1357_v63 }
 0x475   : > { %2444 = vmatprep.mubr.msk.bf16.mxu0 %vm2809_vm3, %v2808_v29  ;;  %2441 = vmatpush3.bf16.msra.mxu0 %v2599_v22 }
 0x476   : > { %2442 = vmatprep.subr.bf16.mxu0 %v2808_v29 }
 0x478   : > { %2437 = vmatmul.mubr.msk.bf16.vlgmr.msra.gmra.mxu1 %vm1270_vm8, %v1358_v1 }
 0x479   : > { %2452 = vmatprep.mubr.msk.bf16.mxu1 %vm2809_vm3, %v2808_v29  ;;  %2443 = vmatpush3.bf16.msra.mxu0 %v2600_v28 }
 0x47a   : > { %2456 = vmatprep.subr.bf16.mxu0 %v2808_v29 }
 0x4e7   : > { %v1328_v2 = vpop.xlane.xlu0 %1327 }
 0x4e8   : > { %v1340_v6 = vpop.xlane.xlu1 %1339 }
 0x4e9   : > { %v1348_v12 = vadd.f32 %v1340_v6, %v1328_v2  ;;  %v2237_v6 = vld [vmem:[%s3344_s8] ss:$0 sm:$0xff] }
 0x4eb   : > { %v1331_v3 = vpop.xlane.xlu0 %1330  ;;  %2627 = vrcp.f32 %v1348_v12 }
 0x4ef   : > { %v1343_v9 = vpop.xlane.xlu0 %1342  ;;  %v1334_v18 = vpop.xlane.xlu1 %1333 }
 0x4f0   : > { %v1349_v16 = vadd.f32 %v1343_v9, %v1331_v3 }
 0x4f2   : > { %2629 = vrcp.f32 %v1349_v16  ;;  %v2602_v16 = vld [vmem:[%s3346_s10] sm:$0xff]  }
 0x4f3   : > { %v1346_v17 = vpop.xlane.xlu0 %1345  ;;  %v1325_v57 = vpop.xlane.xlu1 %1324 }
 0x4f4   : > { %v1350_v23 = vadd.f32 %v1346_v17, %v1334_v18 }
 0x4f6   : > { %2631 = vrcp.f32 %v1350_v23 }
 0x4f7   : > { %v1337_v56 = vpop.xlane.xlu0 %1336 }
 0x4f8   : > { %v2628_v36 = vpop.eup %2627  ;;  %v1347_v58 = vadd.f32 %v1337_v56, %v1325_v57 }
 0x4fa   : > { %2633 = vrcp.f32 %v1347_v58 }
 0x4ff   : > { %v2630_v43 = vpop.eup %2629 }
 0x503   : > { %v2632_v50 = vpop.eup %2631 }
 0x507   : > { %v2634_v59 = vpop.eup %2633 }
 0x51b   : > { %v1407_v4 = vpop.f32.mrf.mxu0 }
 0x51d   : > { %v2396_v7 = vpop.f32.mrf.mxu0 }
 0x51f   : > { %v1410_v10 = vpop.f32.mrf.mxu0 }
 0x520   : > { %v1456_v11 = vpop.f32.mrf.mxu1 }
 0x521   : > { %v2397_v13 = vpop.f32.mrf.mxu0 }
 0x522   : > { %v2402_v14 = vpop.f32.mrf.mxu1 }
 0x524   : > { %v1459_v15 = vpop.f32.mrf.mxu1  ;;  %v1505_v5 = vpop.f32.mrf.mxu0 }
 0x526   : > { %v2403_v8 = vpop.f32.mrf.mxu1  ;;  %v2408_v0 = vpop.f32.mrf.mxu0 }
 0x528   : > { %v1508_v19 = vpop.f32.mrf.mxu0  ;;  %v1554_v21 = vpop.f32.mrf.mxu1 }
 0x529   : > { %v2241_v19 = vld [vmem:[%s3345_s9] ss:$0 sm:$0xff] }
 0x52a   : > { %v2409_v24 = vpop.f32.mrf.mxu0  ;;  %v2414_v25 = vpop.f32.mrf.mxu1 }
 0x52c   : > { %v1557_v26 = vpop.f32.mrf.mxu1  ;;  %v1603_v27 = vpop.f32.mrf.mxu0 }
 0x52d   : > { %v1604_v30 = vadd.f32 %v1603_v27, %v1407_v4 }
 0x52e   : > { %v2415_v32 = vpop.f32.mrf.mxu1  ;;  %v2420_v34 = vpop.f32.mrf.mxu0 }
 0x52f   : > { %v1756_v61 = vmul.f32 %v2634_v59, %v1604_v30 }
 0x530   : > { %v1606_v33 = vpop.f32.mrf.mxu0  ;;  %v1652_v20 = vpop.f32.mrf.mxu1 }
 0x531   : > { %v1653_v35 = vadd.f32 %v1652_v20, %v1456_v11  ;;  %v2242_v33 = vld [vmem:[%s3384_s18] ss:$0 sm:$0xff] }
 0x532   : > { %v2421_v37 = vpop.f32.mrf.mxu0  ;;  %v2426_v38 = vpop.f32.mrf.mxu1 }
 0x533   : > { %v1757_v39 = vmul.f32 %v2628_v36, %v1653_v35 }
 0x534   : > { %v1655_v40 = vpop.f32.mrf.mxu1  ;;  %v1701_v41 = vpop.f32.mrf.mxu0 }
 0x535   : > { %v1702_v42 = vadd.f32 %v1701_v41, %v1505_v5  ;;  %1761 = vrot.lane.b32.xlu1 %v1757_v39, %s2815_s17  ;;  %v2601_v5 = vld [vmem:[%s3346_s10 + $0x8] sm:$0xff]   ;;  %s3383_s17 = sld [smem:[#allocation23_spill]] }
 0x536   : > { %v2427_v44 = vpop.f32.mrf.mxu1  ;;  %v2432_v45 = vpop.f32.mrf.mxu0  ;;  %2449 = vmatpush3.bf16.msra.mxu1 %v2601_v5 }
 0x537   : > { %v1758_v46 = vmul.f32 %v2630_v43, %v1702_v42  ;;  %2450 = vmatprep.subr.bf16.mxu1 %v2808_v29 }
 0x538   : > { %v1704_v47 = vpop.f32.mrf.mxu0  ;;  %v1750_v48 = vpop.f32.mrf.mxu1 }
 0x539   : > { %v1751_v49 = vadd.f32 %v1750_v48, %v1554_v21  ;;  %1765 = vrot.lane.b32.xlu0 %v1758_v46, %s2816_s15  ;;  %v2246_v48 = vld [vmem:[%s3385_s2] ss:$0 sm:$0xff] }
 0x53a   : > { %v2433_v51 = vpop.f32.mrf.mxu0  ;;  %v2438_v52 = vpop.f32.mrf.mxu1  ;;  %2451 = vmatpush3.bf16.msra.mxu1 %v2602_v16 }
 0x53b   : > { %v1759_v53 = vmul.f32 %v2632_v50, %v1751_v49  ;;  %v2603_v24 = vld [vmem:[%s3383_s17 + $0x38] sm:$0xff]   ;;  %v2604_v25 = vld [vmem:[%s3383_s17 + $0x30] sm:$0xff]   ;;  %v2605_v26 = vld [vmem:[%s3383_s17 + $0x28] sm:$0xff]  }
 0x53c   : > { %v1753_v54 = vpop.f32.mrf.mxu1  ;;  %v2606_v27 = vld [vmem:[%s3383_s17 + $0x20] sm:$0xff]   ;;  %v2607_v28 = vld [vmem:[%s3383_s17 + $0x18] sm:$0xff]   ;;  %v2608_v30 = vld [vmem:[%s3383_s17 + $0x10] sm:$0xff]  }
 0x53d   : > { %1769 = vrot.lane.b32.xlu1 %v1759_v53, %s2817_s14  ;;  %v2609_v32 = vld [vmem:[%s3383_s17 + $0x8] sm:$0xff]   ;;  %v2610_v34 = vld [vmem:[%s3383_s17] sm:$0xff]  }
 0x53e   : > { %v2439_v55 = vpop.f32.mrf.mxu1 }
 0x5a7   : > { %v1762_v60 = vpop.permute.xlu1 %1761 }
 0x5a8   : > { %v1772_v63 = vsel %vm898_vm5, %v1756_v61, %v1762_v60 }
 0x5ab   : > { %v1766_v62 = vpop.permute.xlu0 %1765 }
 0x5ac   : > { %v1773_v1 = vsel %vm1270_vm8, %v1772_v63, %v1766_v62 }
 0x5af   : > { %v1770_v2 = vpop.permute.xlu1 %1769 }
 0x5b0   : > { %v1775_v3 = vsel %vm1774_vm9, %v1773_v1, %v1770_v2 }
 0x5b1   : > { %v1776_v4 = vpack.c.bf16 %v1775_v3, %v1775_v3 }
 0x5b3   : > { %2445 = vmatmul.mubr.msk.bf16.vlgmr.msra.gmra.mxu0 %vm732_vm4, %v1776_v4 }
 0x5b4   : > { %2472 = vmatprep.mubr.msk.bf16.mxu0 %vm2809_vm3, %v2808_v29  ;;  %2457 = vmatpush3.bf16.msra.mxu0 %v2603_v24 }
 0x5b5   : > { %2458 = vmatprep.subr.bf16.mxu0 %v2808_v29 }
 0x5b8   : > { %2459 = vmatpush3.bf16.msra.mxu0 %v2604_v25 }
 0x5b9   : > { %2460 = vmatprep.subr.bf16.mxu0 %v2808_v29 }
 0x5bc   : > { %2461 = vmatpush3.bf16.msra.mxu0 %v2605_v26 }
 0x5bd   : > { %2462 = vmatprep.subr.bf16.mxu0 %v2808_v29 }
 0x5c0   : > { %2463 = vmatpush3.bf16.msra.mxu0 %v2606_v27 }
 0x5c1   : > { %2464 = vmatprep.subr.bf16.mxu0 %v2808_v29 }
 0x5c4   : > { %2465 = vmatpush3.bf16.msra.mxu0 %v2607_v28 }
 0x5c5   : > { %2466 = vmatprep.subr.bf16.mxu0 %v2808_v29 }
 0x5c8   : > { %2467 = vmatpush3.bf16.msra.mxu0 %v2608_v30 }
 0x5c9   : > { %2468 = vmatprep.subr.bf16.mxu0 %v2808_v29 }
 0x5cc   : > { %2469 = vmatpush3.bf16.msra.mxu0 %v2609_v32 }
 0x5cd   : > { %2470 = vmatprep.subr.bf16.mxu0 %v2808_v29 }
 0x5d0   : > { %2471 = vmatpush3.bf16.msra.mxu0 %v2610_v34 }
 0x673   : > { %v1837_v7 = vpop.f32.mrf.mxu0 }
 0x674   : > { %v1838_v9 = vadd.f32 %v2237_v6, %v1837_v7 }
 0x675   : > { %v2446_v10 = vpop.f32.mrf.mxu0 }
 0x676   : > { %v1843_v11 = vadd.f32 %v1838_v9, %v3069_v31 }
 0x677   : > { %v1840_v12 = vpop.f32.mrf.mxu0 }
 0x678   : > { %v1844_v13 = vmul.f32 %v1843_v11, %v1843_v11 }
 0x679   : > { %v2447_v14 = vpop.f32.mrf.mxu0 }
 0x67a   : > { %v1845_v15 = vsel %vm732_vm4, %v1844_v13, 0.0 }
 0x67b   : > { %1846 = vadd.xlane.f32.xlu1 %v1845_v15 }
 0x704   : > { %v1847_v17 = vpop.xlane.xlu1 %1846 }
 0x705   : > { %v1849_v8 = vmul.f32 0.03125, %v1847_v17 }
 0x707   : > { %v1850_v0 = vadd.f32 1e-06, %v1849_v8 }
 0x709   : > { %2635 = vrsqrt.f32 %v1850_v0 }
 0x716   : > { %v2636_v18 = vpop.eup %2635 }
 0x717   : > { %v1852_v21 = vmul.f32 %v2636_v18, %v1843_v11 }
 0x719   : > { %v1860_v22 = vmul.f32 %v2241_v19, %v1852_v21 }
 0x71b   : > { %v1861_v23 = vpack.c.bf16 %v1860_v22, %v1860_v22 }
 0x71d   : > { %2453 = vmatmul.mubr.msk.bf16.vlgmr.msra.gmra.mxu1 %vm732_vm4, %v1861_v23 }
 0x7dd   : > { %v1922_v20 = vpop.f32.mrf.mxu1 }
 0x7de   : > { %v1923_v35 = vadd.f32 %v2242_v33, %v1922_v20 }
 0x7df   : > { %v2454_v36 = vpop.f32.mrf.mxu1 }
 0x7e0   : > { %v1928_v37 = vmul.f32 %v1923_v35, %v1923_v35 }
 0x7e1   : > { %v1925_v38 = vpop.f32.mrf.mxu1 }
 0x7e2   : > { %v1929_v39 = vmul.f32 %v1928_v37, %v1923_v35 }
 0x7e3   : > { %v2455_v40 = vpop.f32.mrf.mxu1 }
 0x7e4   : > { %v1930_v41 = vmul.f32 0.044715, %v1929_v39 }
 0x7e6   : > { %v1931_v42 = vadd.f32 %v1930_v41, %v1923_v35 }
 0x7e8   : > { %v1932_v43 = vmul.f32 0.7978846, %v1931_v42 }
 0x7ea   : > { %2637 = vtanh.f32 %v1932_v43 }
 0x7f7   : > { %v2638_v44 = vpop.eup %2637 }
 0x7f8   : > { %v1934_v45 = vadd.f32 1.0, %v2638_v44 }
 0x7fa   : > { %v1935_v46 = vmul.f32 0.5, %v1934_v45 }
 0x7fc   : > { %v1936_v29 = vmul.f32 %v1935_v46, %v1923_v35 }
 0x7fe   : > { %v1937_v47 = vpack.c.bf16 %v1936_v29, %v1936_v29 }
 0x800   : > { %2473 = vmatmul.mubr.bf16.vlgmr.msra.gmra.mxu0 %v1937_v47 }
 0x8c0   : > { %v2043_v49 = vpop.f32.mrf.mxu0 }
 0x8c1   : > { %v2044_v50 = vadd.f32 %v2246_v48, %v2043_v49 }
 0x8c2   : > { %v2474_v51 = vpop.f32.mrf.mxu0  ;;  %2054 = sbr.rel (%p2255_p1) target bundleno = 2411 (0x96b), region = 96 }
 0x8c3   : > { %v2049_v52 = vadd.f32 %v2044_v50, %v3069_v31 }
 0x8c4   : > { %v2046_v53 = vpop.f32.mrf.mxu0 }
 0x8c5   : > { %2050 = vst.msk [vmem:[#allocation2] sm:$0xff] %vm732_vm4, %v2049_v52 }
 0x8c6   : > { %v2475_v54 = vpop.f32.mrf.mxu0 }
 0x8c7   : > { %v2055_v55 = vmul.f32 %v2049_v52, %v2049_v52  ;;  %v2256_v31 = vld [vmem:[%s3386_s12] ss:$0 sm:$0xff] }
 0x8c9   : > { %v2056_v56 = vsel %vm732_vm4, %v2055_v55, 0.0 }
 0x8ca   : > { %2057 = vadd.xlane.f32.xlu0 %v2056_v56 }
 0x953   : > { %v2058_v57 = vpop.xlane.xlu0 %2057 }
 0x954   : > { %v2059_v58 = vmul.f32 0.03125, %v2058_v57 }
 0x956   : > { %v2060_v59 = vadd.f32 1e-06, %v2059_v58 }
 0x958   : > { %2639 = vrsqrt.f32 %v2060_v59 }
 0x965   : > { %v2640_v60 = vpop.eup %2639 }
 0x966   : > { %v2062_v61 = vmul.f32 %v2640_v60, %v2049_v52 }
 0x968   : > { %v2070_v62 = vmul.f32 %v2256_v31, %v2062_v61 }
 0x96a   : > { %2071 = vst.msk [vmem:[%s3031_s29] sm:$0xff] %vm732_vm4, %v2070_v62 }
 0x96b PF: > { %s2258_s13 = sshll.u32 %s2783_s22, 7  ;;  %s3388_s16 = sld [smem:[#allocation26_spill]] }
 0x96c   : > { %s2086_s18 = sshll.u32 %s3031_s29, 4  ;;  %s2073_s28 = scalar_lea.sflag [#allocation7], %s3013_s11  ;;  %s2087_s18 = int_to_ptr.vmem [resolvable:$true] %s2086_s18 }
 0x96d   : > { %s2695_s23 = scalar_lea.vmem %s2087_s18, 128  ;;  %s2818_s2 = smov [#allocation10]  }
 0x96e   : > { %p2696_p10 = scmp.ne.s32.totalorder %s2087_s18, %s2695_s23  ;;  %s2699_s26 = sshll.u32 %s2818_s2, 4  ;;  %s2700_s26 = int_to_ptr.vmem [resolvable:$false] %s2699_s26 }
 0x96f   : > { %s2701_s27 = scalar_lea.vmem %s2700_s26, 256  ;;  %p2702_p7 = scmp.lt.s32.totalorder %s2087_s18, %s2700_s26 }
 0x970   : > { %p2697_p2 = pnand %p2696_p10, %p2985_p12  ;;  %p2703_p9 = scmp.lt.s32.totalorder %s2701_s27, %s2695_s23 }
 0x971   : > { %s2084_s30 = scalar_lea.hbm %s3388_s16, %s2258_s13 }
 0x972   : > { %p2698_p5 = pneg %p2697_p2  ;;  %p2704_p6 = por %p2703_p9, %p2702_p7 }
 0x974   : > { %p2705_p11 = pnand %p2704_p6, %p2698_p5 }
 0x976   : > { %2708 = shalt.err (!%p2705_p11)
}
 0x977   : > { %s2709_s22 = scalar_lea.hbm %s2084_s30, 128  ;;  %s2713_s12 = scalar_lea.hbm %s3388_s16, 256 }
 0x978   : > { %p2710_p13 = scmp.ne.s32.totalorder %s2084_s30, %s2709_s22  ;;  %p2714_p8 = scmp.lt.s32.totalorder %s2084_s30, %s3388_s16 }
 0x979   : > { %p2715_p4 = scmp.lt.s32.totalorder %s2713_s12, %s2709_s22 }
 0x97a   : > { %p2711_p0 = pnand %p2710_p13, %p2985_p12 }
 0x97b   : > { %p2716_p1 = por %p2715_p4, %p2714_p8 }
 0x97c   : > { %p2712_p3 = pneg %p2711_p0 }
 0x97e   : > { %p2717_p10 = pnand %p2716_p1, %p2712_p3 }
 0x980   : > { %2720 = shalt.err (!%p2717_p10)
}
 0x981   : > { %2482 = dma.vmem_to_hbm [thread:$0]  (%p2985_p12), %s2087_s18, 128, %s2084_s30, %s2073_s28  }
 0x982 PF: > { %s3389_s14 = sld [smem:[#allocation16_spill]] }
 0x983   : > { %s3390_s23 = sld [smem:[#allocation14_spill]] }
 0x984   : > { %s3391_s2 = sld [smem:[#allocation17_spill]] }
 0x988   : > { %p2499_p2 = scmp.ge.s32.totalorder %s3389_s14, 2 }
 0x989   : > { %s2098_s26 = sand.u32 1, %s3390_s23  }
 0x98a   : > { %p3392_p5 = scmp.ne.s32.totalorder %s3391_s2, 0  ;;  %s2099_s27 = scalar_lea.sflag [#allocation7], %s2098_s26 }
 0x98c   : > { %p2493_p7 = pnand %p2499_p2, %p3392_p5 }
 0x98e   : > { %p2494_p9 = pneg %p2493_p7 }
 0x990   : > { %2762 = dma.done.wait (%p2494_p9), %s2099_s27, 128  }
 0x991   : > { %2764 = vsyncadd (%p2494_p9), %s2099_s27, 4294967168  ;;  %s32_s11 = sadd.s32 1, %s3389_s14   ;;  %s3393_s21 = sld [smem:[#allocation15_spill]] }
 0x992   : > { %p29_p6 = scmp.ge.s32.totalorder %s32_s11, 6   ;;  %s3394_s23 = sld [smem:[#allocation18_spill]] }
 0x993   : > { %s3395_s30 = sld [smem:[#allocation20_spill]]  ;;  %s3396_s18 = smov %s2771_s19 }
 0x994   : > { %s3397_s19 = smov %s2775_s20  ;;  %s3398_s20 = smov %s3004_s25 }
 0x995   : > { %s3399_s22 = smov %s2791_s24  ;;  %s3401_s25 = smov %s32_s11 }
 0x996   :  { %31 = sbr.rel (!%p29_p6) target bundleno = 15 (0xf), region = 146 }
 0x999   : > { %s3400_s24 = smov %s3395_s30 }
 0x99b   :  { %2104 = vsyncpa [#allocation6], 1 }
 0x99c   :  { %2106 = vsyncpa [#allocation6 + $0x1], 1 }
 0x99d   :  { %2107 = vsyncpa [#allocation9], 1 }
 0x99e   :  { %2108 = vsyncpa [#allocation7], 1 }
 0x99f   :  { %2110 = vsyncpa [#allocation7 + $0x1], 1 }

</bundles_post_ra>
